<compile_context>
chip_gen: v7x
topology: tpu7x:2x2x1
jax: 0.10.0
libtpu: 0.0.40
codegen_flags: <defaults>
</compile_context>

<pallas_src>
import math
from functools import partial

import jax
import jax.numpy as jnp
from jax.experimental import pallas as pl
from jax.experimental.pallas import tpu as pltpu

EPS = 1e-6


def _layernorm(x, a, b, eps=EPS):
    # Matches the PyTorch LayerNorm module exactly: unbiased std (ddof=1),
    # and division by (std + eps), NOT sqrt(var + eps).
    d = x.shape[-1]
    mean = jnp.mean(x, axis=-1, keepdims=True)
    xc = x - mean
    var = jnp.sum(xc * xc, axis=-1, keepdims=True) * (1.0 / (d - 1))
    inv = 1.0 / (jnp.sqrt(var) + eps)          # small (rows,1) divide, broadcast-mul
    return a * (xc * inv) + b


# -----------------------------------------------------------------------------
# Fused Pallas kernel: one grid step == one encoder layer (+ final norm on last)
# -----------------------------------------------------------------------------
def encoder_fused_kernel(x_ref, bias_ref, wqkv_ref, wo_ref, w1_ref, w2_ref,
                         vecs_ref, b1_ref, fab_ref, o_ref, *, nb_head, d_k):
    l = pl.program_id(0)
    H, dk = nb_head, d_k
    D = H * dk
    scale = 1.0 / math.sqrt(dk)

    # Seed the VMEM-resident carry (the output block) with the input activations.
    @pl.when(l == 0)
    def _():
        o_ref[...] = x_ref[...]

    # Only the small packed vector slab is hoisted; the big weights are read at
    # their single matmul call site so Mosaic can stream them.
    vec = vecs_ref[...]                                  # (9, D)
    ln1a, ln1b = vec[0:1, :], vec[1:2, :]
    bqkv = jnp.concatenate([vec[2:3, :], vec[3:4, :], vec[4:5, :]], axis=-1)  # (1,3D)
    bo = vec[5:6, :]
    ln2a, ln2b = vec[6:7, :], vec[7:8, :]
    b2 = vec[8:9, :]

    x = o_ref[...]                                       # (BS, D) carry

    # ---- sublayer 1: pre-norm + multi-headed self-attention + residual ----
    xn = _layernorm(x, ln1a, ln1b)                       # (BS, D)
    # Single fused, lane-dense QKV projection.
    qkv = jnp.dot(xn, wqkv_ref[...],
                  preferred_element_type=jnp.float32) + bqkv    # (BS, 3D)

    # Head-major split (pure layout plumbing; no matmuls, no broadcast of xn).
    def heads(base):
        return jnp.stack(
            [qkv[:, base + h * dk: base + (h + 1) * dk] for h in range(H)], axis=0)

    qh, kh, vh = heads(0), heads(D), heads(2 * D)        # each (H, BS, dk)

    # Scores for all heads / all rows at once (batch separation + key masking both
    # live in the precomputed additive bias: 0 keep, -1e9 masked / cross-batch).
    s = jnp.einsum('hqd,hkd->hqk', qh, kh,
                   preferred_element_type=jnp.float32) * scale   # (H, BS, BS)
    s = s + bias_ref[...]                                        # (1, BS, BS)
    s = s - jnp.max(s, axis=-1, keepdims=True)
    p = jnp.exp(s)
    p = p * pl.reciprocal(jnp.sum(p, axis=-1, keepdims=True), approx=True)

    oh = jnp.einsum('hqk,hkd->hqd', p, vh,
                    preferred_element_type=jnp.float32)          # (H, BS, dk)
    # Repack heads into lanes -> the head reduction happens inside the MXU K-dim
    # of a single (BS, D) @ (D, D) matmul against Wo.
    o_packed = jnp.concatenate([oh[h] for h in range(H)], axis=-1)   # (BS, D)
    x = x + jnp.dot(o_packed, wo_ref[...],
                    preferred_element_type=jnp.float32) + bo          # dropout == id

    # ---- sublayer 2: pre-norm + position-wise feed-forward + residual ----
    xn2 = _layernorm(x, ln2a, ln2b)
    h1 = jnp.maximum(
        jnp.dot(xn2, w1_ref[...], preferred_element_type=jnp.float32) + b1_ref[...],
        0.0)
    x = x + jnp.dot(h1, w2_ref[...], preferred_element_type=jnp.float32) + b2

    o_ref[...] = x

    # Final encoder LayerNorm, applied once on the last layer's output.
    @pl.when(l == pl.num_programs(0) - 1)
    def _():
        fab = fab_ref[...]
        o_ref[...] = _layernorm(o_ref[...], fab[0:1, :], fab[1:2, :])


# -----------------------------------------------------------------------------
# Wrapper: pack weights (fused QKV, packed small vectors), single pallas_call
# -----------------------------------------------------------------------------
def encoder_forward(x, mask, layer_params, final_a, final_b, nb_head, d_k):
    B, S, D = x.shape
    L = len(layer_params)
    BS = B * S

    stack = lambda key: jnp.stack([p[key] for p in layer_params], axis=0)

    # Fused QKV weight/bias: columns ordered [Wq | Wk | Wv].
    wqkv = jnp.concatenate([stack("wq"), stack("wk"), stack("wv")], axis=-1)  # (L,D,3D)
    wo = stack("wo")                                                          # (L,D,D)
    w1 = stack("w1")                                                          # (L,D,F)
    w2 = stack("w2")                                                          # (L,F,D)
    # All tiny (1, D) vectors packed into one per-layer ref (rows:
    # [ln1a, ln1b, bq, bk, bv, bo, ln2a, ln2b, b2]); b1 is (1, F) so kept separate.
    vecs = jnp.concatenate([stack("ln1a"), stack("ln1b"),
                            stack("bq"), stack("bk"), stack("bv"),
                            stack("bo"),
                            stack("ln2a"), stack("ln2b"),
                            stack("b2")], axis=1)                             # (L,9,D)
    b1 = stack("b1")                                                          # (L,1,F)
    fab = jnp.concatenate([final_a, final_b], axis=0)                         # (2, D)

    # Additive attention bias over flattened (B*S) rows: 0 = keep, -1e9 = masked key
    # OR cross-batch pair (keeps attention block-diagonal over batches).
    same_b = jnp.eye(B, dtype=x.dtype)[:, None, :, None]        # (B,1,B,1)
    key_keep = mask[:, 0][None, None, :, :]                     # (1,1,B,S)
    keep = jnp.broadcast_to(same_b * key_keep, (B, S, B, S)).reshape(BS, BS)
    attn_bias = ((keep - 1.0) * 1e9)[None]                      # (1, BS, BS)

    x2d = x.reshape(BS, D)

    def layer_spec(shape):
        # Block over the leading (squeezed) layer axis, full extent elsewhere.
        nd = len(shape) - 1
        return pl.BlockSpec((None,) + tuple(shape[1:]),
                            lambda l, _nd=nd: (l,) + (0,) * _nd)

    def const_spec(shape):
        # Constant block index -> fetched once, stays resident across all layers.
        nd = len(shape)
        return pl.BlockSpec(tuple(shape), lambda l, _nd=nd: (0,) * _nd)

    in_specs = [
        const_spec(x2d.shape),        # x          (BS, D)
        const_spec(attn_bias.shape),  # attn bias  (1, BS, BS)
        layer_spec(wqkv.shape),       # fused QKV  (L, D, 3D)
        layer_spec(wo.shape),         # Wo         (L, D, D)
        layer_spec(w1.shape),         # W1         (L, D, F)
        layer_spec(w2.shape),         # W2         (L, F, D)
        layer_spec(vecs.shape),       # packed small vectors (L, 9, D)
        layer_spec(b1.shape),         # b1         (L, 1, F)
        const_spec(fab.shape),        # final norm a/b (2, D)
    ]

    kernel = partial(encoder_fused_kernel, nb_head=nb_head, d_k=d_k)
    out2d = pl.pallas_call(
        kernel,
        out_shape=jax.ShapeDtypeStruct((BS, D), x.dtype),
        grid=(L,),
        in_specs=in_specs,
        # Constant block index => output stays resident in VMEM across all layers
        # and is written back to HBM exactly once.
        out_specs=const_spec((BS, D)),
        compiler_params=pltpu.CompilerParams(
            dimension_semantics=("arbitrary",),      # layers are sequential
            vmem_limit_bytes=32 * 1024 * 1024),
    )(x2d, attn_bias, wqkv, wo, w1, w2, vecs, b1, fab)
    return out2d.reshape(B, S, D)


# -----------------------------------------------------------------------------
# Pure-JAX reference (faithful port of the PyTorch module, dropout == identity)
# -----------------------------------------------------------------------------
def _ref_encoder(x, mask, layer_params, final_a, final_b, nb_head, d_k):
    hp = jax.lax.Precision.HIGHEST
    B, S, D = x.shape
    m4 = mask[:, None]                                   # (B,1,1,S) like unsqueeze(1)

    def mha(xn, p):
        q = jnp.matmul(xn, p["wq"], precision=hp) + p["bq"]
        k = jnp.matmul(xn, p["wk"], precision=hp) + p["bk"]
        v = jnp.matmul(xn, p["wv"], precision=hp) + p["bv"]
        q = q.reshape(B, S, nb_head, d_k).transpose(0, 2, 1, 3)
        k = k.reshape(B, S, nb_head, d_k).transpose(0, 2, 1, 3)
        v = v.reshape(B, S, nb_head, d_k).transpose(0, 2, 1, 3)
        s = jnp.matmul(q, k.transpose(0, 1, 3, 2), precision=hp) / math.sqrt(d_k)
        s = jnp.where(m4 == 0.0, -1e9, s)
        pattn = jax.nn.softmax(s, axis=-1)
        o = jnp.matmul(pattn, v, precision=hp)
        o = o.transpose(0, 2, 1, 3).reshape(B, S, D)
        return jnp.matmul(o, p["wo"], precision=hp) + p["bo"]

    for p in layer_params:
        x = x + mha(_layernorm(x, p["ln1a"], p["ln1b"]), p)
        xn2 = _layernorm(x, p["ln2a"], p["ln2b"])
        h1 = jax.nn.relu(jnp.matmul(xn2, p["w1"], precision=hp) + p["b1"])
        x = x + jnp.matmul(h1, p["w2"], precision=hp) + p["b2"]
    return _layernorm(x, final_a, final_b)


# -----------------------------------------------------------------------------
# Main
# -----------------------------------------------------------------------------
if __name__ == "__main__":
    B, S, D = 2, 8, 32          # batch, seq, model_dimension
    H = 4                       # nb_head
    DK = D // H                 # d_k
    F = 64                      # feed_forward_dimension
    N_LAYERS = 2

    key = jax.random.PRNGKey(0)

    def init_linear(k, fan_in, fan_out):
        k1, k2 = jax.random.split(k)
        w = jax.random.normal(k1, (fan_in, fan_out), jnp.float32) / math.sqrt(fan_in)
        b = 0.01 * jax.random.normal(k2, (1, fan_out), jnp.float32)
        return w, b

    layer_params = []
    for _ in range(N_LAYERS):
        key, *ks = jax.random.split(key, 7)
        wq, bq = init_linear(ks[0], D, D)
        wk, bk = init_linear(ks[1], D, D)
        wv, bv = init_linear(ks[2], D, D)
        wo, bo = init_linear(ks[3], D, D)
        w1, b1 = init_linear(ks[4], D, F)
        w2, b2 = init_linear(ks[5], F, D)
        layer_params.append(dict(
            wq=wq, bq=bq, wk=wk, bk=bk, wv=wv, bv=bv, wo=wo, bo=bo,
            w1=w1, b1=b1, w2=w2, b2=b2,
            ln1a=jnp.ones((1, D), jnp.float32), ln1b=jnp.zeros((1, D), jnp.float32),
            ln2a=jnp.ones((1, D), jnp.float32), ln2b=jnp.zeros((1, D), jnp.float32)))
    final_a = jnp.ones((1, D), jnp.float32)
    final_b = jnp.zeros((1, D), jnp.float32)

    key, kx = jax.random.split(key)
    x = jax.random.normal(kx, (B, S, D), jnp.float32)
    mask = jnp.ones((B, 1, S), jnp.float32)
    mask = mask.at[1, 0, 6:].set(0.0)     # mask out last two keys of batch 1

    out = encoder_forward(x, mask, layer_params, final_a, final_b, H, DK)
    out = jax.block_until_ready(out)

    ref = _ref_encoder(x, mask, layer_params, final_a, final_b, H, DK)
    assert out.shape == (B, S, D)
    assert bool(jnp.all(jnp.isfinite(out)))
    assert bool(jnp.allclose(out, ref, atol=5e-3, rtol=5e-3)), "mismatch vs reference"

    print("KERNEL_OK")
</pallas_src>

<mosaic_0001>
module attributes {stable_mosaic.version = 11 : i64} {
  func.func @encoder_fused_kernel(%arg0: i32, %arg1: memref<16x32xf32, #tpu.memory_space<vmem>>, %arg2: memref<1x16x16xf32, #tpu.memory_space<vmem>>, %arg3: memref<1x32x96xf32, #tpu.memory_space<vmem>>, %arg4: memref<1x32x32xf32, #tpu.memory_space<vmem>>, %arg5: memref<1x32x64xf32, #tpu.memory_space<vmem>>, %arg6: memref<1x64x32xf32, #tpu.memory_space<vmem>>, %arg7: memref<1x9x32xf32, #tpu.memory_space<vmem>>, %arg8: memref<1x1x64xf32, #tpu.memory_space<vmem>>, %arg9: memref<2x32xf32, #tpu.memory_space<vmem>>, %arg10: memref<16x32xf32, #tpu.memory_space<vmem>>) attributes {dimension_semantics = [#tpu.dimension_semantics<arbitrary>], iteration_bounds = array<i64: 2>, scalar_prefetch = 0 : i64, scratch_operands = 0 : i64, tpu.core_type = #tpu.core_type<tc>, window_params = [{pipeline_mode = #tpu.pipeline_mode<synchronous>, transform_indices = @transform_0, window_bounds = array<i64: 16, 32>}, {pipeline_mode = #tpu.pipeline_mode<synchronous>, transform_indices = @transform_1, window_bounds = array<i64: 1, 16, 16>}, {transform_indices = @transform_2, window_bounds = array<i64: 1, 32, 96>}, {transform_indices = @transform_3, window_bounds = array<i64: 1, 32, 32>}, {transform_indices = @transform_4, window_bounds = array<i64: 1, 32, 64>}, {transform_indices = @transform_5, window_bounds = array<i64: 1, 64, 32>}, {transform_indices = @transform_6, window_bounds = array<i64: 1, 9, 32>}, {transform_indices = @transform_7, window_bounds = array<i64: 1, 1, 64>}, {pipeline_mode = #tpu.pipeline_mode<synchronous>, transform_indices = @transform_8, window_bounds = array<i64: 2, 32>}, {pipeline_mode = #tpu.pipeline_mode<synchronous>, transform_indices = @transform_9, window_bounds = array<i64: 16, 32>}]} {
    %c0_i32 = arith.constant 0 : i32
    %0 = arith.cmpi eq, %arg0, %c0_i32 : i32
    %1 = arith.extui %0 : i1 to i32
    %c0_i32_0 = arith.constant 0 : i32
    %2 = arith.cmpi ne, %1, %c0_i32_0 : i32
    scf.if %2 {
      %c0_47 = arith.constant 0 : index
      %c0_48 = arith.constant 0 : index
      %143 = vector.load %arg1[%c0_47, %c0_48] : memref<16x32xf32, #tpu.memory_space<vmem>>, vector<16x32xf32>
      %c0_49 = arith.constant 0 : index
      %c0_50 = arith.constant 0 : index
      %144 = vector.load %arg10[%c0_49, %c0_50] : memref<16x32xf32, #tpu.memory_space<vmem>>, vector<16x32xf32>
      tpu.vector_store %arg10[%c0_49, %c0_50], %143 {strides = array<i32>} : memref<16x32xf32, #tpu.memory_space<vmem>>, vector<16x32xf32>,
    } else {
    }
    %c0 = arith.constant 0 : index
    %c0_1 = arith.constant 0 : index
    %c0_2 = arith.constant 0 : index
    %3 = vector.load %arg7[%c0, %c0_1, %c0_2] : memref<1x9x32xf32, #tpu.memory_space<vmem>>, vector<1x9x32xf32>
    %4 = vector.shape_cast %3 : vector<1x9x32xf32> to vector<9x32xf32>
    %5 = vector.extract_strided_slice %4 {offsets = [0, 0], sizes = [1, 32], strides = [1, 1]} : vector<9x32xf32> to vector<1x32xf32>
    %6 = vector.extract_strided_slice %4 {offsets = [1, 0], sizes = [1, 32], strides = [1, 1]} : vector<9x32xf32> to vector<1x32xf32>
    %7 = vector.extract_strided_slice %4 {offsets = [2, 0], sizes = [1, 32], strides = [1, 1]} : vector<9x32xf32> to vector<1x32xf32>
    %8 = vector.extract_strided_slice %4 {offsets = [3, 0], sizes = [1, 32], strides = [1, 1]} : vector<9x32xf32> to vector<1x32xf32>
    %9 = vector.extract_strided_slice %4 {offsets = [4, 0], sizes = [1, 32], strides = [1, 1]} : vector<9x32xf32> to vector<1x32xf32>
    %10 = tpu.concatenate %7, %8, %9 in 1 : vector<1x32xf32>, vector<1x32xf32>, vector<1x32xf32> -> vector<1x96xf32>
    %11 = vector.extract_strided_slice %4 {offsets = [5, 0], sizes = [1, 32], strides = [1, 1]} : vector<9x32xf32> to vector<1x32xf32>
    %12 = vector.extract_strided_slice %4 {offsets = [6, 0], sizes = [1, 32], strides = [1, 1]} : vector<9x32xf32> to vector<1x32xf32>
    %13 = vector.extract_strided_slice %4 {offsets = [7, 0], sizes = [1, 32], strides = [1, 1]} : vector<9x32xf32> to vector<1x32xf32>
    %14 = vector.extract_strided_slice %4 {offsets = [8, 0], sizes = [1, 32], strides = [1, 1]} : vector<9x32xf32> to vector<1x32xf32>
    %c0_3 = arith.constant 0 : index
    %c0_4 = arith.constant 0 : index
    %15 = vector.load %arg10[%c0_3, %c0_4] : memref<16x32xf32, #tpu.memory_space<vmem>>, vector<16x32xf32>
    %cst = arith.constant dense<0.000000e+00> : vector<16xf32>
    %16 = vector.multi_reduction <add>, %15, %cst [1] : vector<16x32xf32> to vector<16xf32>
    %17 = vector.shape_cast %16 : vector<16xf32> to vector<16x1xf32>
    %cst_5 = arith.constant 3.200000e+01 : f32
    %18 = vector.broadcast %cst_5 : f32 to vector<16x1xf32>
    %19 = arith.divf %17, %18 : vector<16x1xf32>
    %20 = vector.broadcast %19 : vector<16x1xf32> to vector<16x32xf32>
    %21 = arith.subf %15, %20 : vector<16x32xf32>
    %22 = arith.mulf %21, %21 : vector<16x32xf32>
    %cst_6 = arith.constant dense<0.000000e+00> : vector<16xf32>
    %23 = vector.multi_reduction <add>, %22, %cst_6 [1] : vector<16x32xf32> to vector<16xf32>
    %24 = vector.shape_cast %23 : vector<16xf32> to vector<16x1xf32>
    %cst_7 = arith.constant 0.0322580636 : f32
    %25 = vector.broadcast %cst_7 : f32 to vector<16x1xf32>
    %26 = arith.mulf %24, %25 : vector<16x1xf32>
    %27 = math.sqrt %26 : vector<16x1xf32>
    %cst_8 = arith.constant 9.99999997E-7 : f32
    %28 = vector.broadcast %cst_8 : f32 to vector<16x1xf32>
    %29 = arith.addf %27, %28 : vector<16x1xf32>
    %cst_9 = arith.constant 1.000000e+00 : f32
    %30 = vector.broadcast %cst_9 : f32 to vector<16x1xf32>
    %31 = arith.divf %30, %29 : vector<16x1xf32>
    %32 = vector.broadcast %31 : vector<16x1xf32> to vector<16x32xf32>
    %33 = arith.mulf %21, %32 : vector<16x32xf32>
    %34 = vector.broadcast %5 : vector<1x32xf32> to vector<16x32xf32>
    %35 = arith.mulf %34, %33 : vector<16x32xf32>
    %36 = vector.broadcast %6 : vector<1x32xf32> to vector<16x32xf32>
    %37 = arith.addf %35, %36 : vector<16x32xf32>
    %c0_10 = arith.constant 0 : index
    %c0_11 = arith.constant 0 : index
    %c0_12 = arith.constant 0 : index
    %38 = vector.load %arg3[%c0_10, %c0_11, %c0_12] : memref<1x32x96xf32, #tpu.memory_space<vmem>>, vector<1x32x96xf32>
    %39 = vector.shape_cast %38 : vector<1x32x96xf32> to vector<32x96xf32>
    %cst_13 = arith.constant dense<0.000000e+00> : vector<16x96xf32>
    %40 = tpu.matmul %37, %39, %cst_13 {dimension_numbers = #tpu.dot_dimension_numbers<[1], [0], [0], [1], [0, 0, 1, 1], [], []>} : vector<16x32xf32>, vector<32x96xf32>, vector<16x96xf32> -> vector<16x96xf32>
    %41 = vector.broadcast %10 : vector<1x96xf32> to vector<16x96xf32>
    %42 = arith.addf %40, %41 : vector<16x96xf32>
    %43 = vector.extract_strided_slice %42 {offsets = [0, 0], sizes = [16, 8], strides = [1, 1]} : vector<16x96xf32> to vector<16x8xf32>
    %44 = vector.extract_strided_slice %42 {offsets = [0, 8], sizes = [16, 8], strides = [1, 1]} : vector<16x96xf32> to vector<16x8xf32>
    %45 = vector.extract_strided_slice %42 {offsets = [0, 16], sizes = [16, 8], strides = [1, 1]} : vector<16x96xf32> to vector<16x8xf32>
    %46 = vector.extract_strided_slice %42 {offsets = [0, 24], sizes = [16, 8], strides = [1, 1]} : vector<16x96xf32> to vector<16x8xf32>
    %47 = vector.shape_cast %43 : vector<16x8xf32> to vector<1x16x8xf32>
    %48 = vector.shape_cast %44 : vector<16x8xf32> to vector<1x16x8xf32>
    %49 = vector.shape_cast %45 : vector<16x8xf32> to vector<1x16x8xf32>
    %50 = vector.shape_cast %46 : vector<16x8xf32> to vector<1x16x8xf32>
    %51 = tpu.concatenate %47, %48, %49, %50 in 0 : vector<1x16x8xf32>, vector<1x16x8xf32>, vector<1x16x8xf32>, vector<1x16x8xf32> -> vector<4x16x8xf32>
    %52 = vector.extract_strided_slice %42 {offsets = [0, 32], sizes = [16, 8], strides = [1, 1]} : vector<16x96xf32> to vector<16x8xf32>
    %53 = vector.extract_strided_slice %42 {offsets = [0, 40], sizes = [16, 8], strides = [1, 1]} : vector<16x96xf32> to vector<16x8xf32>
    %54 = vector.extract_strided_slice %42 {offsets = [0, 48], sizes = [16, 8], strides = [1, 1]} : vector<16x96xf32> to vector<16x8xf32>
    %55 = vector.extract_strided_slice %42 {offsets = [0, 56], sizes = [16, 8], strides = [1, 1]} : vector<16x96xf32> to vector<16x8xf32>
    %56 = vector.shape_cast %52 : vector<16x8xf32> to vector<1x16x8xf32>
    %57 = vector.shape_cast %53 : vector<16x8xf32> to vector<1x16x8xf32>
    %58 = vector.shape_cast %54 : vector<16x8xf32> to vector<1x16x8xf32>
    %59 = vector.shape_cast %55 : vector<16x8xf32> to vector<1x16x8xf32>
    %60 = tpu.concatenate %56, %57, %58, %59 in 0 : vector<1x16x8xf32>, vector<1x16x8xf32>, vector<1x16x8xf32>, vector<1x16x8xf32> -> vector<4x16x8xf32>
    %61 = vector.extract_strided_slice %42 {offsets = [0, 64], sizes = [16, 8], strides = [1, 1]} : vector<16x96xf32> to vector<16x8xf32>
    %62 = vector.extract_strided_slice %42 {offsets = [0, 72], sizes = [16, 8], strides = [1, 1]} : vector<16x96xf32> to vector<16x8xf32>
    %63 = vector.extract_strided_slice %42 {offsets = [0, 80], sizes = [16, 8], strides = [1, 1]} : vector<16x96xf32> to vector<16x8xf32>
    %64 = vector.extract_strided_slice %42 {offsets = [0, 88], sizes = [16, 8], strides = [1, 1]} : vector<16x96xf32> to vector<16x8xf32>
    %65 = vector.shape_cast %61 : vector<16x8xf32> to vector<1x16x8xf32>
    %66 = vector.shape_cast %62 : vector<16x8xf32> to vector<1x16x8xf32>
    %67 = vector.shape_cast %63 : vector<16x8xf32> to vector<1x16x8xf32>
    %68 = vector.shape_cast %64 : vector<16x8xf32> to vector<1x16x8xf32>
    %69 = tpu.concatenate %65, %66, %67, %68 in 0 : vector<1x16x8xf32>, vector<1x16x8xf32>, vector<1x16x8xf32>, vector<1x16x8xf32> -> vector<4x16x8xf32>
    "tpu.trace_start"() <{level = 10 : i32, message = "hqd,hkd->hqk"}> : () -> ()
    %cst_14 = arith.constant dense<0.000000e+00> : vector<4x16x16xf32>
    %70 = tpu.matmul %51, %60, %cst_14 {dimension_numbers = #tpu.dot_dimension_numbers<[2], [2], [1], [1], [0, 0, 0, 1, 1, 1], [0], [0]>} : vector<4x16x8xf32>, vector<4x16x8xf32>, vector<4x16x16xf32> -> vector<4x16x16xf32>
    "tpu.trace_stop"() : () -> ()
    %cst_15 = arith.constant 0.353553385 : f32
    %71 = vector.broadcast %cst_15 : f32 to vector<4x16x16xf32>
    %72 = arith.mulf %70, %71 : vector<4x16x16xf32>
    %c0_16 = arith.constant 0 : index
    %c0_17 = arith.constant 0 : index
    %c0_18 = arith.constant 0 : index
    %73 = vector.load %arg2[%c0_16, %c0_17, %c0_18] : memref<1x16x16xf32, #tpu.memory_space<vmem>>, vector<1x16x16xf32>
    %74 = vector.broadcast %73 : vector<1x16x16xf32> to vector<4x16x16xf32>
    %75 = arith.addf %72, %74 : vector<4x16x16xf32>
    %cst_19 = arith.constant dense<0xFF800000> : vector<4x16xf32>
    %76 = vector.multi_reduction <maximumf>, %75, %cst_19 [2] : vector<4x16x16xf32> to vector<4x16xf32>
    %77 = vector.shape_cast %76 : vector<4x16xf32> to vector<4x16x1xf32>
    %78 = vector.broadcast %77 : vector<4x16x1xf32> to vector<4x16x16xf32>
    %79 = arith.subf %75, %78 : vector<4x16x16xf32>
    %80 = math.exp %79 : vector<4x16x16xf32>
    %cst_20 = arith.constant dense<0.000000e+00> : vector<4x16xf32>
    %81 = vector.multi_reduction <add>, %80, %cst_20 [2] : vector<4x16x16xf32> to vector<4x16xf32>
    %82 = vector.shape_cast %81 : vector<4x16xf32> to vector<4x16x1xf32>
    %83 = tpu.reciprocal %82 {approx = true} : vector<4x16x1xf32> -> vector<4x16x1xf32>
    %84 = vector.broadcast %83 : vector<4x16x1xf32> to vector<4x16x16xf32>
    %85 = arith.mulf %80, %84 : vector<4x16x16xf32>
    "tpu.trace_start"() <{level = 10 : i32, message = "hqk,hkd->hqd"}> : () -> ()
    %cst_21 = arith.constant dense<0.000000e+00> : vector<4x16x8xf32>
    %86 = tpu.matmul %85, %69, %cst_21 {dimension_numbers = #tpu.dot_dimension_numbers<[2], [1], [1], [2], [0, 0, 0, 1, 1, 2], [0], [0]>} : vector<4x16x16xf32>, vector<4x16x8xf32>, vector<4x16x8xf32> -> vector<4x16x8xf32>
    "tpu.trace_stop"() : () -> ()
    %87 = vector.extract_strided_slice %86 {offsets = [0, 0, 0], sizes = [1, 16, 8], strides = [1, 1, 1]} : vector<4x16x8xf32> to vector<1x16x8xf32>
    %88 = vector.shape_cast %87 : vector<1x16x8xf32> to vector<16x8xf32>
    %89 = vector.extract_strided_slice %86 {offsets = [1, 0, 0], sizes = [1, 16, 8], strides = [1, 1, 1]} : vector<4x16x8xf32> to vector<1x16x8xf32>
    %90 = vector.shape_cast %89 : vector<1x16x8xf32> to vector<16x8xf32>
    %91 = vector.extract_strided_slice %86 {offsets = [2, 0, 0], sizes = [1, 16, 8], strides = [1, 1, 1]} : vector<4x16x8xf32> to vector<1x16x8xf32>
    %92 = vector.shape_cast %91 : vector<1x16x8xf32> to vector<16x8xf32>
    %93 = vector.extract_strided_slice %86 {offsets = [3, 0, 0], sizes = [1, 16, 8], strides = [1, 1, 1]} : vector<4x16x8xf32> to vector<1x16x8xf32>
    %94 = vector.shape_cast %93 : vector<1x16x8xf32> to vector<16x8xf32>
    %95 = tpu.concatenate %88, %90, %92, %94 in 1 : vector<16x8xf32>, vector<16x8xf32>, vector<16x8xf32>, vector<16x8xf32> -> vector<16x32xf32>
    %c0_22 = arith.constant 0 : index
    %c0_23 = arith.constant 0 : index
    %c0_24 = arith.constant 0 : index
    %96 = vector.load %arg4[%c0_22, %c0_23, %c0_24] : memref<1x32x32xf32, #tpu.memory_space<vmem>>, vector<1x32x32xf32>
    %97 = vector.shape_cast %96 : vector<1x32x32xf32> to vector<32x32xf32>
    %cst_25 = arith.constant dense<0.000000e+00> : vector<16x32xf32>
    %98 = tpu.matmul %95, %97, %cst_25 {dimension_numbers = #tpu.dot_dimension_numbers<[1], [0], [0], [1], [0, 0, 1, 1], [], []>} : vector<16x32xf32>, vector<32x32xf32>, vector<16x32xf32> -> vector<16x32xf32>
    %99 = arith.addf %15, %98 : vector<16x32xf32>
    %100 = vector.broadcast %11 : vector<1x32xf32> to vector<16x32xf32>
    %101 = arith.addf %99, %100 : vector<16x32xf32>
    %cst_26 = arith.constant dense<0.000000e+00> : vector<16xf32>
    %102 = vector.multi_reduction <add>, %101, %cst_26 [1] : vector<16x32xf32> to vector<16xf32>
    %103 = vector.shape_cast %102 : vector<16xf32> to vector<16x1xf32>
    %cst_27 = arith.constant 3.200000e+01 : f32
    %104 = vector.broadcast %cst_27 : f32 to vector<16x1xf32>
    %105 = arith.divf %103, %104 : vector<16x1xf32>
    %106 = vector.broadcast %105 : vector<16x1xf32> to vector<16x32xf32>
    %107 = arith.subf %101, %106 : vector<16x32xf32>
    %108 = arith.mulf %107, %107 : vector<16x32xf32>
    %cst_28 = arith.constant dense<0.000000e+00> : vector<16xf32>
    %109 = vector.multi_reduction <add>, %108, %cst_28 [1] : vector<16x32xf32> to vector<16xf32>
    %110 = vector.shape_cast %109 : vector<16xf32> to vector<16x1xf32>
    %cst_29 = arith.constant 0.0322580636 : f32
    %111 = vector.broadcast %cst_29 : f32 to vector<16x1xf32>
    %112 = arith.mulf %110, %111 : vector<16x1xf32>
    %113 = math.sqrt %112 : vector<16x1xf32>
    %cst_30 = arith.constant 9.99999997E-7 : f32
    %114 = vector.broadcast %cst_30 : f32 to vector<16x1xf32>
    %115 = arith.addf %113, %114 : vector<16x1xf32>
    %cst_31 = arith.constant 1.000000e+00 : f32
    %116 = vector.broadcast %cst_31 : f32 to vector<16x1xf32>
    %117 = arith.divf %116, %115 : vector<16x1xf32>
    %118 = vector.broadcast %117 : vector<16x1xf32> to vector<16x32xf32>
    %119 = arith.mulf %107, %118 : vector<16x32xf32>
    %120 = vector.broadcast %12 : vector<1x32xf32> to vector<16x32xf32>
    %121 = arith.mulf %120, %119 : vector<16x32xf32>
    %122 = vector.broadcast %13 : vector<1x32xf32> to vector<16x32xf32>
    %123 = arith.addf %121, %122 : vector<16x32xf32>
    %c0_32 = arith.constant 0 : index
    %c0_33 = arith.constant 0 : index
    %c0_34 = arith.constant 0 : index
    %124 = vector.load %arg5[%c0_32, %c0_33, %c0_34] : memref<1x32x64xf32, #tpu.memory_space<vmem>>, vector<1x32x64xf32>
    %125 = vector.shape_cast %124 : vector<1x32x64xf32> to vector<32x64xf32>
    %cst_35 = arith.constant dense<0.000000e+00> : vector<16x64xf32>
    %126 = tpu.matmul %123, %125, %cst_35 {dimension_numbers = #tpu.dot_dimension_numbers<[1], [0], [0], [1], [0, 0, 1, 1], [], []>} : vector<16x32xf32>, vector<32x64xf32>, vector<16x64xf32> -> vector<16x64xf32>
    %c0_36 = arith.constant 0 : index
    %c0_37 = arith.constant 0 : index
    %c0_38 = arith.constant 0 : index
    %127 = vector.load %arg8[%c0_36, %c0_37, %c0_38] : memref<1x1x64xf32, #tpu.memory_space<vmem>>, vector<1x1x64xf32>
    %128 = vector.shape_cast %127 : vector<1x1x64xf32> to vector<1x64xf32>
    %129 = vector.broadcast %128 : vector<1x64xf32> to vector<16x64xf32>
    %130 = arith.addf %126, %129 : vector<16x64xf32>
    %cst_39 = arith.constant 0.000000e+00 : f32
    %131 = vector.broadcast %cst_39 : f32 to vector<16x64xf32>
    %132 = arith.maximumf %130, %131 : vector<16x64xf32>
    %c0_40 = arith.constant 0 : index
    %c0_41 = arith.constant 0 : index
    %c0_42 = arith.constant 0 : index
    %133 = vector.load %arg6[%c0_40, %c0_41, %c0_42] : memref<1x64x32xf32, #tpu.memory_space<vmem>>, vector<1x64x32xf32>
    %134 = vector.shape_cast %133 : vector<1x64x32xf32> to vector<64x32xf32>
    %cst_43 = arith.constant dense<0.000000e+00> : vector<16x32xf32>
    %135 = tpu.matmul %132, %134, %cst_43 {dimension_numbers = #tpu.dot_dimension_numbers<[1], [0], [0], [1], [0, 0, 1, 1], [], []>} : vector<16x64xf32>, vector<64x32xf32>, vector<16x32xf32> -> vector<16x32xf32>
    %136 = arith.addf %101, %135 : vector<16x32xf32>
    %137 = vector.broadcast %14 : vector<1x32xf32> to vector<16x32xf32>
    %138 = arith.addf %136, %137 : vector<16x32xf32>
    %c0_44 = arith.constant 0 : index
    %c0_45 = arith.constant 0 : index
    %139 = vector.load %arg10[%c0_44, %c0_45] : memref<16x32xf32, #tpu.memory_space<vmem>>, vector<16x32xf32>
    tpu.vector_store %arg10[%c0_44, %c0_45], %138 {strides = array<i32>} : memref<16x32xf32, #tpu.memory_space<vmem>>, vector<16x32xf32>,
    %c1_i32 = arith.constant 1 : i32
    %140 = arith.cmpi eq, %arg0, %c1_i32 : i32
    %141 = arith.extui %140 : i1 to i32
    %c0_i32_46 = arith.constant 0 : i32
    %142 = arith.cmpi ne, %141, %c0_i32_46 : i32
    scf.if %142 {
      %c0_47 = arith.constant 0 : index
      %c0_48 = arith.constant 0 : index
      %143 = vector.load %arg9[%c0_47, %c0_48] : memref<2x32xf32, #tpu.memory_space<vmem>>, vector<2x32xf32>
      %c0_49 = arith.constant 0 : index
      %c0_50 = arith.constant 0 : index
      %144 = vector.load %arg10[%c0_49, %c0_50] : memref<16x32xf32, #tpu.memory_space<vmem>>, vector<16x32xf32>
      %145 = vector.extract_strided_slice %143 {offsets = [0, 0], sizes = [1, 32], strides = [1, 1]} : vector<2x32xf32> to vector<1x32xf32>
      %146 = vector.extract_strided_slice %143 {offsets = [1, 0], sizes = [1, 32], strides = [1, 1]} : vector<2x32xf32> to vector<1x32xf32>
      %cst_51 = arith.constant dense<0.000000e+00> : vector<16xf32>
      %147 = vector.multi_reduction <add>, %144, %cst_51 [1] : vector<16x32xf32> to vector<16xf32>
      %148 = vector.shape_cast %147 : vector<16xf32> to vector<16x1xf32>
      %cst_52 = arith.constant 3.200000e+01 : f32
      %149 = vector.broadcast %cst_52 : f32 to vector<16x1xf32>
      %150 = arith.divf %148, %149 : vector<16x1xf32>
      %151 = vector.broadcast %150 : vector<16x1xf32> to vector<16x32xf32>
      %152 = arith.subf %144, %151 : vector<16x32xf32>
      %153 = arith.mulf %152, %152 : vector<16x32xf32>
      %cst_53 = arith.constant dense<0.000000e+00> : vector<16xf32>
      %154 = vector.multi_reduction <add>, %153, %cst_53 [1] : vector<16x32xf32> to vector<16xf32>
      %155 = vector.shape_cast %154 : vector<16xf32> to vector<16x1xf32>
      %cst_54 = arith.constant 0.0322580636 : f32
      %156 = vector.broadcast %cst_54 : f32 to vector<16x1xf32>
      %157 = arith.mulf %155, %156 : vector<16x1xf32>
      %158 = math.sqrt %157 : vector<16x1xf32>
      %cst_55 = arith.constant 9.99999997E-7 : f32
      %159 = vector.broadcast %cst_55 : f32 to vector<16x1xf32>
      %160 = arith.addf %158, %159 : vector<16x1xf32>
      %cst_56 = arith.constant 1.000000e+00 : f32
      %161 = vector.broadcast %cst_56 : f32 to vector<16x1xf32>
      %162 = arith.divf %161, %160 : vector<16x1xf32>
      %163 = vector.broadcast %162 : vector<16x1xf32> to vector<16x32xf32>
      %164 = arith.mulf %152, %163 : vector<16x32xf32>
      %165 = vector.broadcast %145 : vector<1x32xf32> to vector<16x32xf32>
      %166 = arith.mulf %165, %164 : vector<16x32xf32>
      %167 = vector.broadcast %146 : vector<1x32xf32> to vector<16x32xf32>
      %168 = arith.addf %166, %167 : vector<16x32xf32>
      %c0_57 = arith.constant 0 : index
      %c0_58 = arith.constant 0 : index
      %169 = vector.load %arg10[%c0_57, %c0_58] : memref<16x32xf32, #tpu.memory_space<vmem>>, vector<16x32xf32>
      tpu.vector_store %arg10[%c0_57, %c0_58], %168 {strides = array<i32>} : memref<16x32xf32, #tpu.memory_space<vmem>>, vector<16x32xf32>,
    } else {
    }
    return
  }
  func.func @transform_0(%arg0: i32) -> (i32, i32) {
    %c0_i32 = arith.constant 0 : i32
    %c0_i32_0 = arith.constant 0 : i32
    %c0_i32_1 = arith.constant 0 : i32
    return %c0_i32, %c0_i32_0 : i32, i32
  }
  func.func @transform_1(%arg0: i32) -> (i32, i32, i32) {
    %c0_i32 = arith.constant 0 : i32
    %c0_i32_0 = arith.constant 0 : i32
    %c0_i32_1 = arith.constant 0 : i32
    %c0_i32_2 = arith.constant 0 : i32
    return %c0_i32, %c0_i32_0, %c0_i32_1 : i32, i32, i32
  }
  func.func @transform_2(%arg0: i32) -> (i32, i32, i32) {
    %c0_i32 = arith.constant 0 : i32
    %c0_i32_0 = arith.constant 0 : i32
    %c0_i32_1 = arith.constant 0 : i32
    return %arg0, %c0_i32, %c0_i32_0 : i32, i32, i32
  }
  func.func @transform_3(%arg0: i32) -> (i32, i32, i32) {
    %c0_i32 = arith.constant 0 : i32
    %c0_i32_0 = arith.constant 0 : i32
    %c0_i32_1 = arith.constant 0 : i32
    return %arg0, %c0_i32, %c0_i32_0 : i32, i32, i32
  }
  func.func @transform_4(%arg0: i32) -> (i32, i32, i32) {
    %c0_i32 = arith.constant 0 : i32
    %c0_i32_0 = arith.constant 0 : i32
    %c0_i32_1 = arith.constant 0 : i32
    return %arg0, %c0_i32, %c0_i32_0 : i32, i32, i32
  }
  func.func @transform_5(%arg0: i32) -> (i32, i32, i32) {
    %c0_i32 = arith.constant 0 : i32
    %c0_i32_0 = arith.constant 0 : i32
    %c0_i32_1 = arith.constant 0 : i32
    return %arg0, %c0_i32, %c0_i32_0 : i32, i32, i32
  }
  func.func @transform_6(%arg0: i32) -> (i32, i32, i32) {
    %c0_i32 = arith.constant 0 : i32
    %c0_i32_0 = arith.constant 0 : i32
    %c0_i32_1 = arith.constant 0 : i32
    return %arg0, %c0_i32, %c0_i32_0 : i32, i32, i32
  }
  func.func @transform_7(%arg0: i32) -> (i32, i32, i32) {
    %c0_i32 = arith.constant 0 : i32
    %c0_i32_0 = arith.constant 0 : i32
    %c0_i32_1 = arith.constant 0 : i32
    return %arg0, %c0_i32, %c0_i32_0 : i32, i32, i32
  }
  func.func @transform_8(%arg0: i32) -> (i32, i32) {
    %c0_i32 = arith.constant 0 : i32
    %c0_i32_0 = arith.constant 0 : i32
    %c0_i32_1 = arith.constant 0 : i32
    return %c0_i32, %c0_i32_0 : i32, i32
  }
  func.func @transform_9(%arg0: i32) -> (i32, i32) {
    %c0_i32 = arith.constant 0 : i32
    %c0_i32_0 = arith.constant 0 : i32
    %c0_i32_1 = arith.constant 0 : i32
    return %c0_i32, %c0_i32_0 : i32, i32
  }
}

</mosaic_0001>

<bundles_post_ra>
// kernel: tpu_custom_call.1
= control target key start
LH: loop header
LB: loop body
LE: loop exit
PB: predicated region body
PF: predicated region fallthrough
CT: control target
= control target key end

     0   :  { %14 = vsyncpa [#allocation3], 0  ;;  %s2971_s0 = inlined_call_operand.hbm [shape: f32[16,32], index: 0, kind: input, shape index: {}]   ;;  %s2972_s1 = inlined_call_operand.hbm [shape: f32[1,16,16], index: 1, kind: input, shape index: {}]   ;;  %s2973_s2 = inlined_call_operand.vmem [shape: f32[2,32,96], index: 2, kind: input, shape index: {}]   ;;  %s2974_s3 = inlined_call_operand.vmem [shape: f32[2,32,32], index: 3, kind: input, shape index: {}]   ;;  %s2975_s4 = inlined_call_operand.vmem [shape: f32[2,32,64], index: 4, kind: input, shape index: {}]   ;;  %s2976_s5 = inlined_call_operand.vmem [shape: f32[2,64,32], index: 5, kind: input, shape index: {}]   ;;  %s2977_s6 = inlined_call_operand.vmem [shape: f32[2,9,32], index: 6, kind: input, shape index: {}]   ;;  %s2978_s7 = inlined_call_operand.vmem [shape: f32[2,1,64], index: 7, kind: input, shape index: {}]   ;;  %s2979_s8 = inlined_call_operand.vmem [shape: f32[2,32], index: 8, kind: input, shape index: {}]   ;;  %s2980_s9 = inlined_call_operand.hbm [shape: f32[16,32], index: 9, kind: output, shape index: {}]  }
   0x1   :  { %15 = vsyncpa [#allocation6], 0 }
   0x2   :  { %16 = vsyncpa [#allocation4], 0  ;;  %s2614_s30 = smov 0  }
   0x3 LB: > { %s2620_s10 = sadd.s32 4294967295, %s2547_s30   ;;  %p1993_p0 = scmp.ge.s32.totalorder %s2547_s30, 1  ;;  %s2547_s30 = sphi %s2614_s30, %s22_s30  }
   0x4   : > { %p267_p1 = scmp.lt.s32.totalorder %s2547_s30, 3  ;;  %s2549_s11 = smov [#allocation2]  }
   0x5   : > { %s279_s12 = sshll.u32 %s2549_s11, 4  ;;  %p2981_p4 = scmp.eq.s32.totalorder %s2620_s10, 0  ;;  %s280_s12 = int_to_ptr.vmem [resolvable:$true] %s279_s12 }
   0x6   : > { %p2625_p3 = pnand %p1993_p0, %p267_p1  ;;  %s2550_s14 = smov [#allocation5]  }
   0x7   : > { %s292_s15 = sshll.u32 %s2550_s14, 4  ;;  %s2447_s19 = scalar_lea.hbm %s2971_s0, 256  ;;  %s2638_s15 = int_to_ptr.vmem [resolvable:$true] %s292_s15 }
   0x8   : > { %s2983_s13 = scalar_select %p2625_p3, 1, 0 }
   0x9   : > { %p2315_p5 = pneg %p2625_p3  ;;  %p2448_p7 = scmp.ne.s32.totalorder %s2971_s0, %s2447_s19 }
   0xa   : > { %p2454_p11 = scmp.lt.u32.totalorder %s2447_s19, %s2971_s0 }
   0xb   : > { %p2634_p6 = pnand %p2981_p4, %p2315_p5 }
   0xd   : > { %p2449_p8 = pneg %p2634_p6 }
   0xf   : > { %p2450_p9 = pnand %p2449_p8, %p2448_p7 }
  0x11   : > { %p2451_p10 = pneg %p2450_p9 }
  0x13   : > { %p2456_p12 = pnand %p2454_p11, %p2451_p10 }
  0x15   : > { %2459 = shalt.err (!%p2456_p12)
}
  0x16   : > { %s2460_s24 = scalar_lea.vmem %s280_s12, 256  ;;  %p2468_p5 = scmp.lt.s32.totalorder %s280_s12, %s280_s12 }
  0x17   : > { %p2461_p13 = scmp.ne.s32.totalorder %s280_s12, %s2460_s24  ;;  %p2469_p2 = scmp.lt.s32.totalorder %s2460_s24, %s2460_s24 }
  0x19   : > { %p2463_p0 = pnand %p2461_p13, %p2449_p8  ;;  %p2470_p4 = por %p2469_p2, %p2468_p5 }
  0x1b   : > { %p2464_p1 = pneg %p2463_p0 }
  0x1d   : > { %p2471_p3 = pnand %p2470_p4, %p2464_p1 }
  0x1f   : > { %2474 = shalt.err (!%p2471_p3)
}
  0x20   : > { %s2551_s25 = smov 128   ;;  %s2552_s26 = smov 8  }
  0x21   : > { %2318 = dma.hbm_to_vmem [thread:$0]  (!%p2634_p6), %s2971_s0, 256, %s280_s12, [#allocation3], %s2551_s25, %s2551_s25, %s2552_s26  }
  0x22   : > { %s2475_s14 = scalar_lea.hbm %s2972_s1, 256 }
  0x23   : > { %p2476_p7 = scmp.ne.s32.totalorder %s2972_s1, %s2475_s14  ;;  %p2482_p4 = scmp.lt.u32.totalorder %s2475_s14, %s2972_s1 }
  0x25   : > { %p2478_p2 = pnand %p2476_p7, %p2449_p8 }
  0x27   : > { %p2479_p3 = pneg %p2478_p2 }
  0x29   : > { %p2484_p9 = pnand %p2482_p4, %p2479_p3 }
  0x2b   : > { %2487 = shalt.err (!%p2484_p9)
}
  0x2c   : > { %s2488_s12 = scalar_lea.vmem %s2638_s15, 256  ;;  %p2496_p13 = scmp.lt.s32.totalorder %s2638_s15, %s2638_s15 }
  0x2d   : > { %p2489_p10 = scmp.ne.s32.totalorder %s2638_s15, %s2488_s12  ;;  %p2497_p0 = scmp.lt.s32.totalorder %s2488_s12, %s2488_s12 }
  0x2f   : > { %p2491_p11 = pnand %p2489_p10, %p2449_p8  ;;  %p2498_p1 = por %p2497_p0, %p2496_p13 }
  0x31   : > { %p2492_p12 = pneg %p2491_p11 }
  0x33   : > { %p2499_p5 = pnand %p2498_p1, %p2492_p12 }
  0x35   : > { %2502 = shalt.err (!%p2499_p5)
}
  0x36   : > { %2321 = dma.hbm_to_vmem [thread:$0]  (!%p2634_p6), %s2972_s1, 256, %s2638_s15, [#allocation6], %s2551_s25, %s2551_s25, %s2552_s26  }
  0x37   : > { %p2985_p7 = scmp.ne.s32.totalorder %s2983_s13, 0 }
  0x38   : > { %p2986_p2 = scmp.eq.s32.totalorder (!%p2985_p7), %s2620_s10, 0 }
  0x39   : > { %357 = sbr.rel (%p2985_p7) target bundleno = 3108 (0xc24), region = 56 }
  0x40   : > { %2534 = dma.done.wait (%p2986_p2), [#allocation3], 256   ;;  %p2987_p8 = pmov %p2986_p2 }
  0x41   : > { %p2988_p3 = pmov %p2986_p2 }
  0x42   : > { %2536 = vsyncadd (%p2987_p8), [#allocation3], 4294967040 }
  0x43   : > { %2538 = dma.done.wait (%p2988_p3), [#allocation6], 256   ;;  %p2989_p4 = pmov %p2986_p2 }
  0x44   : > { %p415_p9 = scmp.lt.s32.totalorder %s2620_s10, 1  ;;  %p2990_p6 = scmp.ne.s32.totalorder %s2620_s10, 0 }
  0x45   : > { %2540 = vsyncadd (%p2989_p4), [#allocation6], 4294967040  ;;  %v447_v0 = vld [vmem:[#allocation2] sm:$0xff] (!%p2990_p6)  ;;  %vm449_vm0 = vcmask (!%p2990_p6), 261120   ;;  %v448_v1 = vld [vmem:[#allocation2 + $0x8] sm:$0xff] (!%p2990_p6) }
  0x46   : > { %s2699_s16 = scalar_select %p415_p9, %s2620_s10, 1 }
  0x47   : > { %446 = sbr.rel (%p2990_p6) target bundleno = 78 (0x4e), region = 68  ;;  %450 = vst.msk [vmem:[#allocation7] sm:$0xff] (!%p2990_p6), %vm449_vm0, %v447_v0  ;;  %451 = vst.msk [vmem:[#allocation7 + $0x8] sm:$0xff] (!%p2990_p6), %vm449_vm0, %v448_v1 }
  0x48   : > { %s2050_s13 = sshll.u32 %s2699_s16, 5  ;;  %s2053_s15 = sshll.u32 %s2699_s16, 6 }
  0x49   : > { %s2706_s25 = scalar_lea.vmem %s2973_s2, %s2050_s13  ;;  %s2711_s28 = scalar_lea.vmem %s2974_s3, %s2050_s13 }
  0x4a   : > { %s2716_s14 = scalar_lea.vmem %s2975_s4, %s2050_s13  ;;  %s2721_s19 = scalar_lea.vmem %s2976_s5, %s2053_s15 }
  0x4b   : > { %s2054_s20 = sshll.u32 %s2699_s16, 4  ;;  %s442_s22 = scalar_lea.vmem %s2978_s7, %s2699_s16 }
  0x4c   : > { %s2731_s26 = scalar_lea.vmem %s2977_s6, %s2054_s20 }
  0x4e PF: > { %vm463_vm1 = vcmask 261120   ;;  %v2735_v2 = vld [vmem:[#allocation7] sm:$0xff]  ;;  %v2737_v3 = vld [vmem:[#allocation7 + $0x8] sm:$0xff]  ;;  %v526_v18 = vld [vmem:[%s2706_s25 + $0x10] sm:$0xff]  ;;  %s2553_s13 = smov 32   ;;  %s2554_s15 = smov 64   ;;  %v512_v35 = vlaneseq }
  0x4f   : > { %v469_v4 = vsel %vm463_vm1, %v2735_v2, 0.0  ;;  %v472_v5 = vsel %vm463_vm1, %v2737_v3, 0.0  ;;  %v524_v16 = vld [vmem:[%s2706_s25] sm:$0xff]  ;;  %v525_v17 = vld [vmem:[%s2706_s25 + $0x8] sm:$0xff]  ;;  %v527_v20 = vld [vmem:[%s2706_s25 + $0x18] sm:$0xff]  ;;  %vm465_vm6 = vcmask 523264  }
  0x50   : > { %470 = vadd.xlane.f32.xlu0 %v469_v4  ;;  %v2223_v19 = vpack.c.bf16 %v525_v17, %v524_v16  ;;  %v2227_v21 = vpack.c.bf16 %v527_v20, %v526_v18  ;;  %v2752_v22 = vld [vmem:[%s2731_s26] sm:$0xff]  ;;  %v2757_v41 = vshrl.u32 %v512_v35, 7  ;;  %vm631_vm7 = vcmask 64512   ;;  %s2555_s25 = smov 120   ;;  %s2556_s27 = smov 112   ;;  %v984_v35 = vld [vmem:[#allocation5] sm:$0xff] }
  0x51   : > { %v455_v23 = vrot.slane %v2752_v22, 1  ;;  %v459_v24 = vrot.slane %v2752_v22, 2  ;;  %s2557_s29 = smov 104   ;;  %s2558_s11 = smov 96   ;;  %vm2786_vm8 = vmpackc.low %vm631_vm7, %vm631_vm7  ;;  %vm994_vm9 = vcmask 130048   ;;  %vm1459_vm10 = vcmask 195584  }
  0x52   : > { %2224 = vmatprep.subr.bf16.mxu1 %v2223_v19  ;;  %v514_v43 = vsub.s32 0, %v2757_v41  ;;  %v520_v44 = vsub.s32 1, %v2757_v41  ;;  %v530_v58 = vsub.s32 2, %v2757_v41  ;;  %s2559_s17 = smov 8   ;;  %s2560_s18 = smov 16  }
  0x53   : > { %2226 = vmatpush3.bf16.msra.mxu1 %v2223_v19  ;;  %p2045_p10 = scmp.ne.s32.totalorder %s2620_s10, 1 }
  0x54   : > { %473 = vadd.xlane.f32.xlu0 %v472_v5  ;;  %2228 = vmatprep.subr.bf16.mxu1 %v2227_v21  ;;  %v515_v45 = vrot.slane %v2752_v22, %v514_v43  ;;  %v521_v48 = vrot.slane %v2752_v22, %v520_v44 }
  0x57   : > { %2230 = vmatpush3.bf16.msra.mxu1 %v2227_v21 }
  0x6a   : > { %456 = vrot.lane.b32.xlu0 %v455_v23, %s2553_s13 }
  0xdd   : > { %v471_v6 = vpop.xlane.xlu0 %470 }
  0xde   : > { %v476_v7 = vmul.f32 0.03125, %v471_v6 }
  0xe0   : > { %v478_v8 = vsub.f32 %v2735_v2, %v476_v7 }
  0xe1   : > { %v474_v9 = vpop.xlane.xlu0 %473 }
  0xe2   : > { %v477_v10 = vmul.f32 0.03125, %v474_v9  ;;  %v480_v11 = vmul.f32 %v478_v8, %v478_v8 }
  0xe4   : > { %v479_v12 = vsub.f32 %v2737_v3, %v477_v10  ;;  %v482_v13 = vsel %vm463_vm1, %v480_v11, 0.0 }
  0xe5   : > { %483 = vadd.xlane.f32.xlu1 %v482_v13  ;;  %v457_v55 = vpop.permute.xlu0 %456 }
  0xe6   : > { %v481_v14 = vmul.f32 %v479_v12, %v479_v12  ;;  %v464_v56 = vsel %vm463_vm1, %v2752_v22, %v457_v55 }
  0xe8   : > { %v485_v15 = vsel %vm463_vm1, %v481_v14, 0.0 }
  0xe9   : > { %486 = vadd.xlane.f32.xlu1 %v485_v15 }
  0xfa   : > { %460 = vrot.lane.b32.xlu1 %v459_v24, %s2554_s15 }
 0x172   : > { %v484_v25 = vpop.xlane.xlu1 %483 }
 0x173   : > { %v488_v26 = vmul.f32 0.032258064, %v484_v25 }
 0x175   : > { %2391 = vrsqrt.f32 %v488_v26  ;;  %vm492_vm2 = vcmp.eq.f32.partialorder %v488_v26, inf  ;;  %v495_v31 = vand.u32 2147483648, %v488_v26  ;;  %vm494_vm3 = vcmp.eq.f32.partialorder %v488_v26, 0.0 }
 0x176   : > { %v487_v27 = vpop.xlane.xlu1 %486 }
 0x177   : > { %v489_v28 = vmul.f32 0.032258064, %v487_v27 }
 0x179   : > { %2393 = vrsqrt.f32 %v489_v28  ;;  %vm499_vm4 = vcmp.eq.f32.partialorder %v489_v28, inf  ;;  %v502_v38 = vand.u32 2147483648, %v489_v28  ;;  %vm501_vm5 = vcmp.eq.f32.partialorder %v489_v28, 0.0 }
 0x17a   : > { %v461_v57 = vpop.permute.xlu1 %460 }
 0x17b   : > { %v466_v59 = vsel %vm465_vm6, %v464_v56, %v461_v57 }
 0x17c   : > { %v531_v60 = vrot.slane %v466_v59, %v530_v58 }
 0x17f   : > { %v2392_v29 = vpop.eup %2391 }
 0x180   : > { %v491_v30 = vmul.f32 %v2392_v29, %v488_v26 }
 0x182   : > { %v493_v32 = vsel %vm492_vm2, %v488_v26, %v491_v30 }
 0x183   : > { %v2394_v33 = vpop.eup %2393  ;;  %v496_v34 = vsel %vm494_vm3, %v495_v31, %v493_v32  ;;  %v985_v32 = vld [vmem:[#allocation5 + $0x8] sm:$0xff] }
 0x184   : > { %v498_v36 = vmul.f32 %v2394_v33, %v489_v28  ;;  %v504_v37 = vadd.f32 1e-06, %v496_v34 }
 0x186   : > { %v500_v39 = vsel %vm499_vm4, %v489_v28, %v498_v36  ;;  %2395 = vrcp.f32 %v504_v37 }
 0x187   : > { %v503_v40 = vsel %vm501_vm5, %v502_v38, %v500_v39 }
 0x188   : > { %v505_v42 = vadd.f32 1e-06, %v503_v40 }
 0x18a   : > { %2397 = vrcp.f32 %v505_v42 }
 0x190   : > { %v2396_v46 = vpop.eup %2395 }
 0x191   : > { %v510_v47 = vmul.f32 %v2396_v46, %v478_v8 }
 0x193   : > { %v516_v49 = vmul.f32 %v515_v45, %v510_v47 }
 0x194   : > { %v2398_v50 = vpop.eup %2397 }
 0x195   : > { %v511_v51 = vmul.f32 %v2398_v50, %v479_v12  ;;  %v522_v52 = vadd.f32 %v521_v48, %v516_v49 }
 0x197   : > { %v517_v53 = vmul.f32 %v515_v45, %v511_v51  ;;  %2123 = vmatprep.mubr.msk.f32.mxu1 %vm463_vm1, %v522_v52 }
 0x199   : > { %v523_v54 = vadd.f32 %v521_v48, %v517_v53 }
 0x19b   : > { %2124 = vmatmul.mubr.msk.f32.vlgmr.msra.gmra.mrb[0].mxu1 %vm463_vm1, %v523_v54 }
 0x26e   : > { %v2125_v61 = vpop.f32.mrb[0].mxu1 }
 0x26f   : > { %v610_v62 = vadd.f32 %v2125_v61, %v531_v60  ;;  %v604_v63 = vpop.f32.mrb[1].mxu1 }
 0x270   : > { %v605_v0 = vadd.f32 %v604_v63, %v531_v60 }
 0x271   : > { %617 = vrot.lane.b32.xlu1 %v610_v62, %s2555_s25 }
 0x272   : > { %619 = vrot.lane.b32.xlu0 %v605_v0, %s2556_s27  ;;  %2130 = vmatprep.mubr.msk.f32.mxu1 %vm631_vm7, %v605_v0  ;;  %v2774_v1 = vpack.i.bf16 %v610_v62, %v605_v0 }
 0x275   : > { %615 = vrot.lane.b32.xlu1 %v605_v0, %s2555_s25 }
 0x276   : > { %623 = vrot.lane.b32.xlu0 %v605_v0, %s2557_s29 }
 0x279   : > { %621 = vrot.lane.b32.xlu1 %v610_v62, %s2556_s27 }
 0x27a   : > { %2352 = vrot.lane.b32.xlu0 %v2774_v1, %s2558_s11 }
 0x27d   : > { %625 = vrot.lane.b32.xlu1 %v610_v62, %s2557_s29 }
 0x2e3   : > { %v618_v4 = vpop.permute.xlu1 %617 }
 0x2e4   : > { %v620_v5 = vpop.permute.xlu0 %619 }
 0x2e7   : > { %v616_v6 = vpop.permute.xlu1 %615 }
 0x2e8   : > { %v2777_v7 = vpack.i.bf16 %v618_v4, %v616_v6  ;;  %v624_v8 = vpop.permute.xlu0 %623  ;;  %2137 = vmatprep.mubr.msk.f32.mxu0 %vm631_vm7, %v616_v6 }
 0x2ea   : > { %2357 = vrot.lane.b32.xlu1 %v2777_v7, %s2558_s11 }
 0x2eb   : > { %v622_v9 = vpop.permute.xlu1 %621 }
 0x2ec   : > { %v2781_v10 = vpack.i.bf16 %v622_v9, %v620_v5  ;;  %v2353_v11 = vpop.permute.xlu0 %2352 }
 0x2ed   : > { %v2355_v12 = vunpack.i.h.bf16 %v2353_v11  ;;  %v2354_v13 = vunpack.i.l.bf16 %v2353_v11 }
 0x2ee   : > { %2362 = vrot.lane.b32.xlu0 %v2781_v10, %s2558_s11 }
 0x2ef   : > { %v2231_v15 = vpack.c.bf16 %v2355_v12, %v2354_v13  ;;  %v626_v16 = vpop.permute.xlu1 %625 }
 0x2f0   : > { %v2790_v17 = vpack.i.bf16 %v626_v16, %v624_v8 }
 0x2f1   : > { %2233 = vmatprep.subr.msk.bf16.mxu1 %vm2786_vm8, %v2231_v15 }
 0x2f2   : > { %2236 = vmatpush3.bf16.xpose.msk.msra.mxu1 %vm2786_vm8, %v2231_v15  ;;  %2367 = vrot.lane.b32.xlu1 %v2790_v17, %s2558_s11 }
 0x2f9   : > { %2131 = vmatmul.mubr.msk.f32.vlgmr.msra.gmra.mrb[2].mxu1 %vm631_vm7, %v610_v62 }
 0x2fa   : > { %2144 = vmatprep.mubr.msk.f32.mxu1 %vm631_vm7, %v620_v5 }
 0x35c   : > { %v2358_v18 = vpop.permute.xlu1 %2357 }
 0x35d   : > { %v2360_v19 = vunpack.i.h.bf16 %v2358_v18  ;;  %v2359_v20 = vunpack.i.l.bf16 %v2358_v18 }
 0x35f   : > { %v2237_v21 = vpack.c.bf16 %v2360_v19, %v2359_v20 }
 0x360   : > { %v2363_v23 = vpop.permute.xlu0 %2362 }
 0x361   : > { %v2365_v24 = vunpack.i.h.bf16 %v2363_v23  ;;  %v2364_v25 = vunpack.i.l.bf16 %v2363_v23  ;;  %2239 = vmatprep.subr.msk.bf16.mxu0 %vm2786_vm8, %v2237_v21 }
 0x362   : > { %2242 = vmatpush3.bf16.xpose.msk.msra.mxu0 %vm2786_vm8, %v2237_v21 }
 0x363   : > { %v2243_v26 = vpack.c.bf16 %v2365_v24, %v2364_v25 }
 0x364   : > { %v2368_v27 = vpop.permute.xlu1 %2367 }
 0x365   : > { %v2370_v28 = vunpack.i.h.bf16 %v2368_v27  ;;  %v2369_v29 = vunpack.i.l.bf16 %v2368_v27  ;;  %2245 = vmatprep.subr.msk.bf16.mxu1 %vm2786_vm8, %v2243_v26 }
 0x366   : > { %2248 = vmatpush3.bf16.xpose.msk.msra.mxu1 %vm2786_vm8, %v2243_v26 }
 0x367   : > { %v2249_v30 = vpack.c.bf16 %v2370_v28, %v2369_v29 }
 0x369   : > { %2138 = vmatmul.mubr.msk.f32.vlgmr.msra.gmra.mrb[0].mxu0 %vm631_vm7, %v618_v4  ;;  %2251 = vmatprep.subr.msk.bf16.mxu0 %vm2786_vm8, %v2249_v30 }
 0x36a   : > { %2254 = vmatpush3.bf16.xpose.msk.msra.mxu0 %vm2786_vm8, %v2249_v30  ;;  %2151 = vmatprep.mubr.msk.f32.mxu0 %vm631_vm7, %v624_v8 }
 0x36d   : > { %2145 = vmatmul.mubr.msk.f32.vlgmr.msra.gmra.mrb[4].mxu1 %vm631_vm7, %v622_v9 }
 0x371   : > { %2152 = vmatmul.mubr.msk.f32.vlgmr.msra.gmra.mrb[2].mxu0 %vm631_vm7, %v626_v16 }
 0x3cc   : > { %v2132_v31 = vpop.f32.mrb[2].mxu1 }
 0x3cd   : > { %v977_v33 = vmul.f32 0.35355338, %v2132_v31  ;;  %v706_v34 = vpop.f32.mrb[3].mxu1 }
 0x3ce   : > { %v976_v36 = vmul.f32 0.35355338, %v706_v34 }
 0x3cf   : > { %v987_v37 = vadd.f32 %v985_v32, %v977_v33 }
 0x3d0   : > { %v986_v38 = vadd.f32 %v984_v35, %v976_v36 }
 0x3d1   : > { %v998_v39 = vsel %vm994_vm9, %v987_v37, -inf }
 0x3d2   : > { %999 = vmax.xlane.f32.xlu1 %v998_v39  ;;  %v995_v40 = vsel %vm994_vm9, %v986_v38, -inf }
 0x3d3   : > { %996 = vmax.xlane.f32.xlu0 %v995_v40 }
 0x43c   : > { %v2139_v42 = vpop.f32.mrb[0].mxu0 }
 0x43d   : > { %v979_v45 = vmul.f32 0.35355338, %v2139_v42  ;;  %v793_v46 = vpop.f32.mrb[1].mxu0 }
 0x43e   : > { %v978_v47 = vmul.f32 0.35355338, %v793_v46 }
 0x43f   : > { %v989_v48 = vadd.f32 %v985_v32, %v979_v45 }
 0x440   : > { %v2146_v49 = vpop.f32.mrb[4].mxu1  ;;  %v988_v53 = vadd.f32 %v984_v35, %v978_v47 }
 0x441   : > { %v981_v50 = vmul.f32 0.35355338, %v2146_v49  ;;  %v880_v51 = vpop.f32.mrb[5].mxu1  ;;  %v1004_v52 = vsel %vm994_vm9, %v989_v48, -inf }
 0x442   : > { %v980_v54 = vmul.f32 0.35355338, %v880_v51  ;;  %1005 = vmax.xlane.f32.xlu0 %v1004_v52  ;;  %v1001_v59 = vsel %vm994_vm9, %v988_v53, -inf }
 0x443   : > { %v991_v55 = vadd.f32 %v985_v32, %v981_v50 }
 0x444   : > { %v2153_v56 = vpop.f32.mrb[2].mxu0  ;;  %v990_v61 = vadd.f32 %v984_v35, %v980_v54 }
 0x445   : > { %v983_v57 = vmul.f32 0.35355338, %v2153_v56  ;;  %v967_v58 = vpop.f32.mrb[3].mxu0  ;;  %v1010_v60 = vsel %vm994_vm9, %v991_v55, -inf }
 0x446   : > { %v982_v62 = vmul.f32 0.35355338, %v967_v58  ;;  %1002 = vmax.xlane.f32.xlu0 %v1001_v59  ;;  %1011 = vmax.xlane.f32.xlu1 %v1010_v60  ;;  %v1007_v4 = vsel %vm994_vm9, %v990_v61, -inf }
 0x447   : > { %v993_v63 = vadd.f32 %v985_v32, %v983_v57 }
 0x448   : > { %v992_v5 = vadd.f32 %v984_v35, %v982_v62 }
 0x449   : > { %v1016_v0 = vsel %vm994_vm9, %v993_v63, -inf }
 0x44a   : > { %1017 = vmax.xlane.f32.xlu1 %v1016_v0  ;;  %1008 = vmax.xlane.f32.xlu0 %v1007_v4  ;;  %v1013_v6 = vsel %vm994_vm9, %v992_v5, -inf }
 0x44e   : > { %1014 = vmax.xlane.f32.xlu0 %v1013_v6 }
 0x45f   : > { %v1000_v8 = vpop.xlane.xlu1 %999 }
 0x460   : > { %v1020_v9 = vsub.f32 %v987_v37, %v1000_v8  ;;  %v997_v11 = vpop.xlane.xlu0 %996 }
 0x461   : > { %v1019_v12 = vsub.f32 %v986_v38, %v997_v11 }
 0x462   : > { %v1029_v13 = vmul.f32 1.442695, %v1020_v9 }
 0x463   : > { %v1027_v14 = vmul.f32 1.442695, %v1019_v12 }
 0x464   : > { %2399 = vpow2.f32 %v1029_v13 }
 0x465   : > { %2401 = vpow2.f32 %v1027_v14 }
 0x46e   : > { %v2823_v15 = vpop.eup %2399 }
 0x46f   : > { %v2402_v16 = vpop.eup %2401  ;;  %v1046_v18 = vsel %vm994_vm9, %v2823_v15, 0.0 }
 0x470   : > { %1047 = vadd.xlane.f32.xlu1 %v1046_v18  ;;  %v1043_v19 = vsel %vm994_vm9, %v2402_v16, 0.0 }
 0x471   : > { %1044 = vadd.xlane.f32.xlu0 %v1043_v19 }
 0x4cf   : > { %v1006_v20 = vpop.xlane.xlu0 %1005 }
 0x4d0   : > { %v1022_v21 = vsub.f32 %v989_v48, %v1006_v20 }
 0x4d2   : > { %v1033_v23 = vmul.f32 1.442695, %v1022_v21 }
 0x4d3   : > { %v1003_v24 = vpop.xlane.xlu0 %1002  ;;  %v1012_v25 = vpop.xlane.xlu1 %1011 }
 0x4d4   : > { %2403 = vpow2.f32 %v1033_v23  ;;  %v1021_v26 = vsub.f32 %v988_v53, %v1003_v24  ;;  %v1024_v27 = vsub.f32 %v991_v55, %v1012_v25 }
 0x4d6   : > { %v1031_v28 = vmul.f32 1.442695, %v1021_v26  ;;  %v1037_v29 = vmul.f32 1.442695, %v1024_v27 }
 0x4d7   : > { %v1018_v30 = vpop.xlane.xlu1 %1017  ;;  %v1009_v31 = vpop.xlane.xlu0 %1008 }
 0x4d8   : > { %2405 = vpow2.f32 %v1031_v28  ;;  %v1026_v32 = vsub.f32 %v993_v63, %v1018_v30  ;;  %v1023_v33 = vsub.f32 %v990_v61, %v1009_v31 }
 0x4d9   : > { %2407 = vpow2.f32 %v1037_v29 }
 0x4da   : > { %v1041_v34 = vmul.f32 1.442695, %v1026_v32  ;;  %v1035_v35 = vmul.f32 1.442695, %v1023_v33  ;;  %v1462_v33 = vld [vmem:[%s2711_s28] sm:$0xff] }
 0x4db   : > { %v1015_v36 = vpop.xlane.xlu0 %1014 }
 0x4dc   : > { %2409 = vpow2.f32 %v1041_v34  ;;  %v1025_v37 = vsub.f32 %v992_v5, %v1015_v36  ;;  %v1463_v34 = vld [vmem:[%s2711_s28 + $0x8] sm:$0xff]  ;;  %v1464_v36 = vld [vmem:[%s2711_s28 + $0x10] sm:$0xff] }
 0x4dd   : > { %2411 = vpow2.f32 %v1035_v35  ;;  %v2271_v35 = vpack.c.bf16 %v1463_v34, %v1462_v33 }
 0x4de   : > { %v2828_v38 = vpop.eup %2403  ;;  %v1039_v39 = vmul.f32 1.442695, %v1025_v37  ;;  %v1465_v37 = vld [vmem:[%s2711_s28 + $0x18] sm:$0xff]  ;;  %s2561_s28 = smov 24  }
 0x4df   : > { %v1052_v40 = vsel %vm994_vm9, %v2828_v38, 0.0 }
 0x4e0   : > { %2413 = vpow2.f32 %v1039_v39  ;;  %1053 = vadd.xlane.f32.xlu1 %v1052_v40 }
 0x4e2   : > { %v2832_v42 = vpop.eup %2405 }
 0x4e3   : > { %v2408_v45 = vpop.eup %2407  ;;  %v1049_v46 = vsel %vm994_vm9, %v2832_v42, 0.0 }
 0x4e4   : > { %v1058_v47 = vsel %vm994_vm9, %v2408_v45, 0.0  ;;  %1050 = vadd.xlane.f32.xlu0 %v1049_v46 }
 0x4e5   : > { %1059 = vadd.xlane.f32.xlu1 %v1058_v47 }
 0x4e6   : > { %v2837_v48 = vpop.eup %2409 }
 0x4e7   : > { %v2412_v49 = vpop.eup %2411  ;;  %v1064_v50 = vsel %vm994_vm9, %v2837_v48, 0.0 }
 0x4e8   : > { %v1055_v51 = vsel %vm994_vm9, %v2412_v49, 0.0 }
 0x4e9   : > { %1065 = vadd.xlane.f32.xlu1 %v1064_v50  ;;  %1056 = vadd.xlane.f32.xlu0 %v1055_v51 }
 0x4ea   : > { %v2842_v52 = vpop.eup %2413 }
 0x4eb   : > { %v1061_v53 = vsel %vm994_vm9, %v2842_v52, 0.0 }
 0x4ed   : > { %1062 = vadd.xlane.f32.xlu0 %v1061_v53 }
 0x4fa   : > { %2377 = vrot.lane.b32.xlu1 %v2777_v7, %s2554_s15 }
 0x4fd   : > { %v1048_v57 = vpop.xlane.xlu1 %1047 }
 0x4fe   : > { %2382 = vrot.lane.b32.xlu1 %v2781_v10, %s2554_s15  ;;  %v1045_v54 = vpop.xlane.xlu0 %1044 }
 0x4ff   : > { %2415 = vrcp.f32 %v1045_v54 }
 0x500   : > { %2417 = vrcp.f32 %v1048_v57 }
 0x502   : > { %2387 = vrot.lane.b32.xlu1 %v2790_v17, %s2554_s15 }
 0x503   : > { %2372 = vrot.lane.b32.xlu0 %v2774_v1, %s2554_s15 }
 0x509   : > { %v2416_v55 = vpop.eup %2415 }
 0x50a   : > { %v1075_v56 = vmul.f32 %v2416_v55, %v2402_v16  ;;  %v2418_v9 = vpop.eup %2417 }
 0x50b   : > { %v1076_v24 = vmul.f32 %v2418_v9, %v2823_v15 }
 0x50c   : > { %2158 = vmatprep.mubr.msk.f32.mxu1 %vm994_vm9, %v1075_v56 }
 0x56d   : > { %v1054_v58 = vpop.xlane.xlu1 %1053 }
 0x571   : > { %v1051_v59 = vpop.xlane.xlu0 %1050 }
 0x572   : > { %v1060_v60 = vpop.xlane.xlu1 %1059 }
 0x573   : > { %2419 = vrcp.f32 %v1060_v60 }
 0x576   : > { %v1066_v7 = vpop.xlane.xlu1 %1065  ;;  %v1057_v61 = vpop.xlane.xlu0 %1056 }
 0x577   : > { %2421 = vrcp.f32 %v1057_v61  ;;  %v1551_v61 = vsub.s32 5, %v2757_v41 }
 0x578   : > { %2423 = vrcp.f32 %v1051_v59 }
 0x579   : > { %2425 = vrcp.f32 %v1054_v58 }
 0x57a   : > { %v2378_v10 = vpop.permute.xlu1 %2377  ;;  %v1063_v62 = vpop.xlane.xlu0 %1062 }
 0x57b   : > { %2427 = vrcp.f32 %v1063_v62  ;;  %v2380_v17 = vunpack.i.h.bf16 %v2378_v10  ;;  %v2379_v1 = vunpack.i.l.bf16 %v2378_v10  ;;  %v1552_v10 = vrot.slane %v2752_v22, %v1551_v61 }
 0x57c   : > { %2429 = vrcp.f32 %v1066_v7 }
 0x57d   : > { %v2420_v11 = vpop.eup %2419  ;;  %v2259_v19 = vpack.c.bf16 %v2380_v17, %v2379_v1 }
 0x57e   : > { %v2383_v63 = vpop.permute.xlu1 %2382  ;;  %v2373_v0 = vpop.permute.xlu0 %2372  ;;  %v1080_v25 = vmul.f32 %v2420_v11, %v2408_v45 }
 0x57f   : > { %v2385_v4 = vunpack.i.h.bf16 %v2383_v63  ;;  %v2384_v5 = vunpack.i.l.bf16 %v2383_v63  ;;  %v2375_v6 = vunpack.i.h.bf16 %v2373_v0  ;;  %v2374_v8 = vunpack.i.l.bf16 %v2373_v0 }
 0x581   : > { %v2263_v12 = vpack.c.bf16 %v2385_v4, %v2384_v5  ;;  %v2255_v13 = vpack.c.bf16 %v2375_v6, %v2374_v8  ;;  %v2422_v14 = vpop.eup %2421 }
 0x582   : > { %v2388_v16 = vpop.permute.xlu1 %2387  ;;  %v2424_v18 = vpop.eup %2423  ;;  %v1079_v23 = vmul.f32 %v2422_v14, %v2412_v49 }
 0x583   : > { %v2390_v20 = vunpack.i.h.bf16 %v2388_v16  ;;  %v2389_v21 = vunpack.i.l.bf16 %v2388_v16  ;;  %2256 = vmatprep.subr.bf16.mxu1 %v2255_v13  ;;  %2264 = vmatprep.subr.bf16.mxu0 %v2263_v12  ;;  %v2426_v26 = vpop.eup %2425  ;;  %v1077_v27 = vmul.f32 %v2424_v18, %v2832_v42 }
 0x584   : > { %2258 = vmatpush3.bf16.msra.mxu1 %v2255_v13  ;;  %2266 = vmatpush3.bf16.msra.mxu0 %v2263_v12  ;;  %v1078_v15 = vmul.f32 %v2426_v26, %v2828_v38  ;;  %v2275_v38 = vpack.c.bf16 %v1465_v37, %v1464_v36  ;;  %v1703_v26 = vld [vmem:[%s2721_s19] sm:$0xff] }
 0x585   : > { %2172 = vmatprep.mubr.msk.f32.mxu0 %vm994_vm9, %v1079_v23  ;;  %2260 = vmatprep.subr.bf16.mxu1 %v2259_v19  ;;  %v2428_v28 = vpop.eup %2427  ;;  %v2267_v29 = vpack.c.bf16 %v2390_v20, %v2389_v21  ;;  %v1610_v20 = vld [vmem:[%s2716_s14 + $0x8] sm:$0xff]  ;;  %v1611_v21 = vld [vmem:[%s2716_s14 + $0x10] sm:$0xff] }
 0x586   : > { %v2430_v30 = vpop.eup %2429  ;;  %v1081_v31 = vmul.f32 %v2428_v28, %v2842_v52  ;;  %2272 = vmatprep.subr.bf16.mxu0 %v2271_v35  ;;  %v1705_v28 = vld [vmem:[%s2721_s19 + $0x10] sm:$0xff] }
 0x587   : > { %2159 = vmatmul.mubr.msk.f32.vlgmr.msra.gmra.mrb[6].mxu1 %vm994_vm9, %v1076_v24  ;;  %2173 = vmatmul.mubr.msk.f32.vlgmr.msra.gmra.mrb[4].mxu0 %vm994_vm9, %v1080_v25  ;;  %v1082_v32 = vmul.f32 %v2430_v30, %v2837_v48  ;;  %v1612_v24 = vld [vmem:[%s2716_s14 + $0x18] sm:$0xff] }
 0x588   : > { %2262 = vmatpush3.bf16.msra.mxu1 %v2259_v19  ;;  %2165 = vmatprep.mubr.msk.f32.mxu1 %vm994_vm9, %v1077_v27  ;;  %v1609_v19 = vld [vmem:[%s2716_s14] sm:$0xff]  ;;  %v2283_v25 = vpack.c.bf16 %v1612_v24, %v1611_v21  ;;  %v1704_v27 = vld [vmem:[%s2721_s19 + $0x8] sm:$0xff] }
 0x589   : > { %2268 = vmatprep.subr.bf16.mxu1 %v2267_v29  ;;  %2274 = vmatpush3.bf16.msra.mxu0 %v2271_v35  ;;  %v2279_v23 = vpack.c.bf16 %v1610_v20, %v1609_v19 }
 0x58a   : > { %2276 = vmatprep.subr.bf16.mxu0 %v2275_v38 }
 0x58b   : > { %2166 = vmatmul.mubr.msk.f32.vlgmr.msra.gmra.mrb[8].mxu1 %vm994_vm9, %v1078_v15  ;;  %v1706_v15 = vld [vmem:[%s2721_s19 + $0x18] sm:$0xff] }
 0x58c   : > { %2270 = vmatpush3.bf16.msra.mxu1 %v2267_v29  ;;  %2179 = vmatprep.mubr.msk.f32.mxu1 %vm994_vm9, %v1081_v31  ;;  %v2287_v29 = vpack.c.bf16 %v1704_v27, %v1703_v26  ;;  %v2291_v30 = vpack.c.bf16 %v1706_v15, %v1705_v28  ;;  %v1707_v31 = vld [vmem:[%s2721_s19 + $0x20] sm:$0xff] }
 0x58d   : > { %2278 = vmatpush3.bf16.msra.mxu0 %v2275_v38  ;;  %2280 = vmatprep.subr.bf16.mxu1 %v2279_v23 }
 0x58e   : > { %2288 = vmatprep.subr.bf16.mxu0 %v2287_v29 }
 0x58f   : > { %2180 = vmatmul.mubr.msk.f32.vlgmr.msra.gmra.mrb[10].mxu1 %vm994_vm9, %v1082_v32  ;;  %v1708_v32 = vld [vmem:[%s2721_s19 + $0x28] sm:$0xff] }
 0x590   : > { %2282 = vmatpush3.bf16.msra.mxu1 %v2279_v23  ;;  %v2295_v33 = vpack.c.bf16 %v1708_v32, %v1707_v31 }
 0x591   : > { %2284 = vmatprep.subr.bf16.mxu1 %v2283_v25 }
 0x594   : > { %2286 = vmatpush3.bf16.msra.mxu1 %v2283_v25 }
 0x65a   : > { %v2160_v39 = vpop.f32.mrb[6].mxu1  ;;  %v2174_v40 = vpop.f32.mrb[4].mxu0 }
 0x65b   : > { %v1161_v42 = vpop.f32.mrb[7].mxu1  ;;  %v1335_v45 = vpop.f32.mrb[5].mxu0 }
 0x65e   : > { %v2167_v46 = vpop.f32.mrb[8].mxu1 }
 0x65f   : > { %1435 = vrot.lane.b32.xlu1 %v2167_v46, %s2559_s17  ;;  %v1248_v47 = vpop.f32.mrb[9].mxu1 }
 0x660   : > { %1433 = vrot.lane.b32.xlu0 %v1248_v47, %s2559_s17 }
 0x662   : > { %v2181_v48 = vpop.f32.mrb[10].mxu1 }
 0x663   : > { %1443 = vrot.lane.b32.xlu1 %v2174_v40, %s2560_s18  ;;  %v1422_v49 = vpop.f32.mrb[11].mxu1 }
 0x664   : > { %1441 = vrot.lane.b32.xlu0 %v1335_v45, %s2560_s18 }
 0x667   : > { %1451 = vrot.lane.b32.xlu1 %v2181_v48, %s2561_s28 }
 0x668   : > { %1449 = vrot.lane.b32.xlu0 %v1422_v49, %s2561_s28 }
 0x6d1   : > { %v1436_v50 = vpop.permute.xlu1 %1435 }
 0x6d2   : > { %v1434_v51 = vpop.permute.xlu0 %1433  ;;  %v1456_v56 = vsel %vm631_vm7, %v2160_v39, %v1436_v50 }
 0x6d3   : > { %v1455_v54 = vsel %vm631_vm7, %v1161_v42, %v1434_v51 }
 0x6d5   : > { %v1444_v52 = vpop.permute.xlu1 %1443 }
 0x6d6   : > { %v1442_v53 = vpop.permute.xlu0 %1441  ;;  %v1458_v59 = vsel %vm994_vm9, %v1456_v56, %v1444_v52 }
 0x6d7   : > { %v1457_v57 = vsel %vm994_vm9, %v1455_v54, %v1442_v53  ;;  %v1599_v53 = vsub.s32 6, %v2757_v41  ;;  %v1605_v54 = vsub.s32 7, %v2757_v41 }
 0x6d9   : > { %v1452_v55 = vpop.permute.xlu1 %1451 }
 0x6da   : > { %v1450_v58 = vpop.permute.xlu0 %1449  ;;  %v1461_v7 = vsel %vm1459_vm10, %v1458_v59, %v1452_v55  ;;  %v1600_v55 = vrot.slane %v2752_v22, %v1599_v53 }
 0x6db   : > { %v1460_v60 = vsel %vm1459_vm10, %v1457_v57, %v1450_v58  ;;  %v1606_v58 = vrot.slane %v2752_v22, %v1605_v54  ;;  %v2039_v22 = vld [vmem:[%s442_s22] ss:$0 sm:$0xff] }
 0x6dc   : > { %2190 = vmatprep.mubr.msk.f32.mxu0 %vm463_vm1, %v1460_v60 }
 0x6dd   : > { %2191 = vmatmul.mubr.msk.f32.vlgmr.msra.gmra.mrb[6].mxu0 %vm463_vm1, %v1461_v7 }
 0x6de   : > { %2290 = vmatpush3.bf16.msra.mxu0 %v2287_v29 }
 0x6df   : > { %2292 = vmatprep.subr.bf16.mxu0 %v2291_v30 }
 0x6e2   : > { %2294 = vmatpush3.bf16.msra.mxu0 %v2291_v30 }
 0x6e3   : > { %2296 = vmatprep.subr.bf16.mxu0 %v2295_v33 }
 0x6e6   : > { %2298 = vmatpush3.bf16.msra.mxu0 %v2295_v33 }
 0x7b0   : > { %v2192_v62 = vpop.f32.mrb[6].mxu0 }
 0x7b1   : > { %v1548_v17 = vadd.f32 %v2192_v62, %v2737_v3  ;;  %v1538_v1 = vpop.f32.mrb[7].mxu0 }
 0x7b2   : > { %v1547_v63 = vadd.f32 %v1538_v1, %v2735_v2  ;;  %v1710_v1 = vld [vmem:[%s2721_s19 + $0x38] sm:$0xff] }
 0x7b3   : > { %v2883_v0 = vadd.f32 %v1552_v10, %v1548_v17  ;;  %v1709_v17 = vld [vmem:[%s2721_s19 + $0x30] sm:$0xff] }
 0x7b4   : > { %v2885_v4 = vadd.f32 %v1552_v10, %v1547_v63  ;;  %v2299_v63 = vpack.c.bf16 %v1710_v1, %v1709_v17 }
 0x7b5   : > { %v1558_v5 = vsel %vm463_vm1, %v2883_v0, 0.0 }
 0x7b6   : > { %1559 = vadd.xlane.f32.xlu1 %v1558_v5  ;;  %v1555_v6 = vsel %vm463_vm1, %v2885_v4, 0.0  ;;  %2300 = vmatprep.subr.bf16.mxu0 %v2299_v63 }
 0x7b7   : > { %1556 = vadd.xlane.f32.xlu0 %v1555_v6  ;;  %2302 = vmatpush3.bf16.msra.mxu0 %v2299_v63 }
 0x843   : > { %v1560_v8 = vpop.xlane.xlu1 %1559 }
 0x844   : > { %v1562_v3 = vmul.f32 0.03125, %v1560_v8  ;;  %v1557_v9 = vpop.xlane.xlu0 %1556 }
 0x845   : > { %v1561_v2 = vmul.f32 0.03125, %v1557_v9 }
 0x846   : > { %v2892_v11 = vsub.f32 %v2883_v0, %v1562_v3 }
 0x847   : > { %v1563_v12 = vsub.f32 %v2885_v4, %v1561_v2 }
 0x848   : > { %v1566_v16 = vmul.f32 %v2892_v11, %v2892_v11 }
 0x849   : > { %v1565_v13 = vmul.f32 %v1563_v12, %v1563_v12 }
 0x84a   : > { %v1570_v18 = vsel %vm463_vm1, %v1566_v16, 0.0 }
 0x84b   : > { %v1567_v14 = vsel %vm463_vm1, %v1565_v13, 0.0 }
 0x84c   : > { %1568 = vadd.xlane.f32.xlu0 %v1567_v14 }
 0x850   : > { %1571 = vadd.xlane.f32.xlu0 %v1570_v18 }
 0x8d9   : > { %v1569_v34 = vpop.xlane.xlu0 %1568 }
 0x8da   : > { %v1573_v35 = vmul.f32 0.032258064, %v1569_v34 }
 0x8dc   : > { %2431 = vrsqrt.f32 %v1573_v35  ;;  %vm1577_vm11 = vcmp.eq.f32.partialorder %v1573_v35, inf  ;;  %v1580_v40 = vand.u32 2147483648, %v1573_v35  ;;  %vm1579_vm12 = vcmp.eq.f32.partialorder %v1573_v35, 0.0 }
 0x8dd   : > { %v1572_v36 = vpop.xlane.xlu0 %1571 }
 0x8de   : > { %v1574_v37 = vmul.f32 0.032258064, %v1572_v36 }
 0x8e0   : > { %2433 = vrsqrt.f32 %v1574_v37  ;;  %vm1584_vm13 = vcmp.eq.f32.partialorder %v1574_v37, inf  ;;  %v1587_v49 = vand.u32 2147483648, %v1574_v37  ;;  %vm1586_vm14 = vcmp.eq.f32.partialorder %v1574_v37, 0.0 }
 0x8e6   : > { %v2432_v38 = vpop.eup %2431 }
 0x8e7   : > { %v1576_v39 = vmul.f32 %v2432_v38, %v1573_v35 }
 0x8e9   : > { %v1578_v42 = vsel %vm1577_vm11, %v1573_v35, %v1576_v39 }
 0x8ea   : > { %v2434_v45 = vpop.eup %2433  ;;  %v1581_v46 = vsel %vm1579_vm12, %v1580_v40, %v1578_v42 }
 0x8eb   : > { %v1589_v47 = vadd.f32 1e-06, %v1581_v46  ;;  %v1583_v48 = vmul.f32 %v2434_v45, %v1574_v37 }
 0x8ed   : > { %2435 = vrcp.f32 %v1589_v47  ;;  %v1585_v50 = vsel %vm1584_vm13, %v1574_v37, %v1583_v48 }
 0x8ee   : > { %v1588_v51 = vsel %vm1586_vm14, %v1587_v49, %v1585_v50 }
 0x8ef   : > { %v1590_v52 = vadd.f32 1e-06, %v1588_v51  ;;  %v1806_v51 = vld [vmem:[%s2979_s8] sm:$0x3] (!%p2045_p10) }
 0x8f1   : > { %2437 = vrcp.f32 %v1590_v52  ;;  %v1854_v52 = vrot.slane (!%p2045_p10), %v1806_v51, %v514_v43 }
 0x8f7   : > { %v2436_v56 = vpop.eup %2435 }
 0x8f8   : > { %v1595_v57 = vmul.f32 %v2436_v56, %v1563_v12 }
 0x8fa   : > { %v1601_v59 = vmul.f32 %v1600_v55, %v1595_v57 }
 0x8fb   : > { %v2438_v60 = vpop.eup %2437 }
 0x8fc   : > { %v1596_v7 = vmul.f32 %v2438_v60, %v2892_v11  ;;  %v1607_v61 = vadd.f32 %v1606_v58, %v1601_v59  ;;  %v2044_v11 = vld [vmem:[%s2731_s26 + $0x8] ss:$0 sm:$0xff] }
 0x8fe   : > { %v1602_v10 = vmul.f32 %v1600_v55, %v1596_v7  ;;  %2201 = vmatprep.mubr.msk.f32.mxu1 %vm463_vm1, %v1607_v61  ;;  %v1860_v55 = vrot.slane (!%p2045_p10), %v1806_v51, %v520_v44 }
 0x900   : > { %v1608_v62 = vadd.f32 %v1606_v58, %v1602_v10 }
 0x902   : > { %2202 = vmatmul.mubr.msk.f32.vlgmr.msra.gmra.mrb[12].mxu1 %vm463_vm1, %v1608_v62 }
 0x9d5   : > { %v2203_v5 = vpop.f32.mrb[12].mxu1 }
 0x9d6   : > { %v1698_v6 = vadd.f32 %v2203_v5, %v2039_v22  ;;  %v1692_v8 = vpop.f32.mrb[13].mxu1 }
 0x9d7   : > { %v1693_v3 = vadd.f32 %v2039_v22, %v1692_v8 }
 0x9d8   : > { %v1702_v2 = vmax.f32 %v1698_v6, 0.0 }
 0x9d9   : > { %v1701_v9 = vmax.f32 %v1693_v3, 0.0 }
 0x9db   : > { %2220 = vmatprep.mubr.msk.f32.mxu0 %vm465_vm6, %v1701_v9 }
 0x9dc   : > { %2221 = vmatmul.mubr.msk.f32.vlgmr.msra.gmra.mrb[8].mxu0 %vm465_vm6, %v1702_v2 }
 0xaaf   : > { %v2222_v12 = vpop.f32.mrb[8].mxu0  ;;  %1805 = sbr.rel (%p2045_p10) target bundleno = 3082 (0xc0a), region = 72 }
 0xab0   : > { %v1793_v13 = vadd.f32 %v2222_v12, %v2883_v0  ;;  %v1783_v14 = vpop.f32.mrb[9].mxu0 }
 0xab1   : > { %v1792_v16 = vadd.f32 %v1783_v14, %v2885_v4 }
 0xab2   : > { %v1799_v18 = vadd.f32 %v2044_v11, %v1793_v13 }
 0xab3   : > { %v1798_v19 = vadd.f32 %v2044_v11, %v1792_v16 }
 0xab4   : > { %1801 = vst.msk [vmem:[#allocation7 + $0x8] sm:$0xff] %vm463_vm1, %v1799_v18 }
 0xab5   : > { %1800 = vst.msk [vmem:[#allocation7] sm:$0xff] %vm463_vm1, %v1798_v19 }
 0xabb   : > { %v1808_v21 = vld [vmem:[#allocation7 + $0x8] sm:$0xff] }
 0xabc   : > { %v1807_v20 = vld [vmem:[#allocation7] sm:$0xff]  ;;  %v1812_v24 = vsel %vm463_vm1, %v1808_v21, 0.0 }
 0xabd   : > { %v1809_v23 = vsel %vm463_vm1, %v1807_v20, 0.0 }
 0xabe   : > { %1810 = vadd.xlane.f32.xlu0 %v1809_v23 }
 0xac2   : > { %1813 = vadd.xlane.f32.xlu0 %v1812_v24 }
 0xb4b   : > { %v1811_v0 = vpop.xlane.xlu0 %1810 }
 0xb4c   : > { %v1815_v25 = vmul.f32 0.03125, %v1811_v0 }
 0xb4e   : > { %v1817_v4 = vsub.f32 %v1807_v20, %v1815_v25 }
 0xb4f   : > { %v1814_v26 = vpop.xlane.xlu0 %1813 }
 0xb50   : > { %v1816_v27 = vmul.f32 0.03125, %v1814_v26  ;;  %v1819_v28 = vmul.f32 %v1817_v4, %v1817_v4 }
 0xb52   : > { %v1818_v29 = vsub.f32 %v1808_v21, %v1816_v27  ;;  %v1821_v15 = vsel %vm463_vm1, %v1819_v28, 0.0 }
 0xb53   : > { %1822 = vadd.xlane.f32.xlu1 %v1821_v15 }
 0xb54   : > { %v1820_v30 = vmul.f32 %v1818_v29, %v1818_v29 }
 0xb56   : > { %v1824_v31 = vsel %vm463_vm1, %v1820_v30, 0.0 }
 0xb57   : > { %1825 = vadd.xlane.f32.xlu1 %v1824_v31 }
 0xbe0   : > { %v1823_v32 = vpop.xlane.xlu1 %1822 }
 0xbe1   : > { %v1827_v33 = vmul.f32 0.032258064, %v1823_v32 }
 0xbe3   : > { %2439 = vrsqrt.f32 %v1827_v33  ;;  %vm1831_vm15 = vcmp.eq.f32.partialorder %v1827_v33, inf  ;;  %v1834_v38 = vand.u32 2147483648, %v1827_v33  ;;  %vm1833_vm0 = vcmp.eq.f32.partialorder %v1827_v33, 0.0 }
 0xbe4   : > { %v1826_v34 = vpop.xlane.xlu1 %1825 }
 0xbe5   : > { %v1828_v35 = vmul.f32 0.032258064, %v1826_v34 }
 0xbe7   : > { %2441 = vrsqrt.f32 %v1828_v35  ;;  %vm1838_vm2 = vcmp.eq.f32.partialorder %v1828_v35, inf  ;;  %v1841_v47 = vand.u32 2147483648, %v1828_v35  ;;  %vm1840_vm3 = vcmp.eq.f32.partialorder %v1828_v35, 0.0 }
 0xbed   : > { %v2440_v36 = vpop.eup %2439 }
 0xbee   : > { %v1830_v37 = vmul.f32 %v2440_v36, %v1827_v33 }
 0xbf0   : > { %v1832_v39 = vsel %vm1831_vm15, %v1827_v33, %v1830_v37 }
 0xbf1   : > { %v2442_v40 = vpop.eup %2441  ;;  %v1835_v42 = vsel %vm1833_vm0, %v1834_v38, %v1832_v39 }
 0xbf2   : > { %v1843_v45 = vadd.f32 1e-06, %v1835_v42  ;;  %v1837_v46 = vmul.f32 %v2442_v40, %v1828_v35 }
 0xbf4   : > { %2443 = vrcp.f32 %v1843_v45  ;;  %v1839_v48 = vsel %vm1838_vm2, %v1828_v35, %v1837_v46 }
 0xbf5   : > { %v1842_v49 = vsel %vm1840_vm3, %v1841_v47, %v1839_v48 }
 0xbf6   : > { %v1844_v50 = vadd.f32 1e-06, %v1842_v49 }
 0xbf8   : > { %2445 = vrcp.f32 %v1844_v50 }
 0xbfe   : > { %v2444_v53 = vpop.eup %2443 }
 0xbff   : > { %v1849_v54 = vmul.f32 %v2444_v53, %v1817_v4 }
 0xc01   : > { %v1855_v56 = vmul.f32 %v1854_v52, %v1849_v54 }
 0xc02   : > { %v2446_v57 = vpop.eup %2445 }
 0xc03   : > { %v1861_v58 = vadd.f32 %v1860_v55, %v1855_v56  ;;  %v1850_v59 = vmul.f32 %v2446_v57, %v1818_v29 }
 0xc05   : > { %1863 = vst.msk [vmem:[#allocation7] sm:$0xff] %vm463_vm1, %v1861_v58  ;;  %v1856_v60 = vmul.f32 %v1854_v52, %v1850_v59 }
 0xc07   : > { %v1862_v7 = vadd.f32 %v1860_v55, %v1856_v60 }
 0xc09   : > { %1864 = vst.msk [vmem:[#allocation7 + $0x8] sm:$0xff] %vm463_vm1, %v1862_v7 }
 0xc0a PF: > { %p2326_p11 = scmp.eq.s32.totalorder %s2620_s10, 1  ;;  %s2562_s12 = smov [#allocation7]  }
 0xc0b   : > { %s1871_s21 = sshll.u32 %s2562_s12, 4  ;;  %s1872_s21 = int_to_ptr.vmem [resolvable:$true] %s1871_s21 }
 0xc0c   : > { %s2503_s22 = scalar_lea.vmem %s1872_s21, 256  ;;  %p2510_p1 = scmp.lt.s32.totalorder %s1872_s21, %s1872_s21 }
 0xc0d   : > { %p2504_p12 = scmp.ne.s32.totalorder %s1872_s21, %s2503_s22  ;;  %p2511_p5 = scmp.lt.s32.totalorder %s2503_s22, %s2503_s22 }
 0xc0f   : > { %p2505_p13 = pnand %p2504_p12, %p2326_p11  ;;  %p2512_p7 = por %p2511_p5, %p2510_p1 }
 0xc11   : > { %p2506_p0 = pneg %p2505_p13 }
 0xc13   : > { %p2513_p2 = pnand %p2512_p7, %p2506_p0 }
 0xc15   : > { %2516 = shalt.err (!%p2513_p2)
}
 0xc16   : > { %s2517_s26 = scalar_lea.hbm %s2980_s9, 256 }
 0xc17   : > { %p2518_p8 = scmp.ne.s32.totalorder %s2980_s9, %s2517_s26  ;;  %p2523_p9 = scmp.lt.u32.totalorder %s2517_s26, %s2980_s9 }
 0xc19   : > { %p2519_p3 = pnand %p2518_p8, %p2326_p11 }
 0xc1b   : > { %p2520_p4 = pneg %p2519_p3 }
 0xc1d   : > { %p2525_p6 = pnand %p2523_p9, %p2520_p4 }
 0xc1f   : > { %2528 = shalt.err (!%p2525_p6)
}
 0xc20   : > { %s2563_s29 = smov 128  }
 0xc21   : > { %2312 = dma.vmem_to_hbm [thread:$0]  (%p2326_p11), %s1872_s21, 256, %s2980_s9, [#allocation4], %s2563_s29, %s2563_s29, %s2559_s17  }
 0xc22   : > { %2542 = dma.done.wait (%p2326_p11), [#allocation4], 256  }
 0xc23   : > { %2544 = vsyncadd (%p2326_p11), [#allocation4], 4294967040 }
 0xc24 PF: > { %s22_s30 = sadd.s32 1, %s2547_s30  }
 0xc25   : > { %p19_p10 = scmp.ge.s32.totalorder %s22_s30, 4  }
 0xc27   :  { %21 = sbr.rel (!%p19_p10) target bundleno = 3 (0x3), region = 115 }
 0xc2e   :  { %1887 = vsyncpa [#allocation3], 1 }
 0xc2f   :  { %1889 = vsyncpa [#allocation3 + $0x1], 1 }
 0xc30   :  { %1890 = vsyncpa [#allocation6], 1 }
 0xc31   :  { %1891 = vsyncpa [#allocation4], 1 }
 0xc32   :  { %1893 = vsyncpa [#allocation4 + $0x1], 1 }

</bundles_post_ra>
